<compile_context>
chip_gen: v7x
topology: tpu7x:2x2x1
jax: 0.10.0
libtpu: 0.0.40
codegen_flags: <defaults>
</compile_context>

<pallas_src>
import functools

import jax
import jax.numpy as jnp
from jax.experimental import pallas as pl
from jax.experimental.pallas import tpu as pltpu

BN_EPS = 1e-5


# --------------------------------------------------------------------------
# Pass 1 (only Pallas pass): attention pooling + BN-statistics / penal accumulation.
# --------------------------------------------------------------------------
def _attn_stats_kernel(x_ref, w1_ref, w2_ref, m0_ref, stats_ref, pen_ref):
    # x_ref    : (tb, L, F) bf16 block of the input
    # w1_ref   : (H, F) bf16 == linear_1.weight (native PyTorch layout)
    # w2_ref   : (D, H) bf16 == linear_2.weight (native PyTorch layout)
    # m0_ref   : (tb, D*F) f32 lane-dense un-normalized pooled descriptors
    # stats_ref: (2, F)  f32 per-core resident accumulator (row0=sum, row1=sumsq)
    # pen_ref  : (1, 1)  f32 per-core resident penal accumulator
    ii = pl.program_id(1)

    @pl.when(ii == 0)
    def _init():
        stats_ref[...] = jnp.zeros_like(stats_ref)
        pen_ref[...] = jnp.zeros_like(pen_ref)

    x = x_ref[...]                                    # (tb, L, F) bf16
    tb, L, F = x.shape
    w1 = w1_ref[...]                                  # (H, F) bf16
    w2 = w2_ref[...]                                  # (D, H) bf16
    D = w2.shape[0]

    x2d = x.reshape(tb * L, F)                        # free leading-dim merge

    # s1 = tanh(x @ W1^T): one flattened (tb*L, F) x (H, F)^T MXU matmul, f32 acc.
    s1 = jnp.tanh(
        jax.lax.dot_general(x2d, w1, (((1,), (1,)), ((), ())),
                            preferred_element_type=jnp.float32))     # (tb*L, H) f32

    # logits = s1 @ W2^T: one flattened 2-D MXU matmul (no per-batch broadcast).
    logits = jax.lax.dot_general(s1.astype(jnp.bfloat16), w2,
                                 (((1,), (1,)), ((), ())),
                                 preferred_element_type=jnp.float32)  # (tb*L, D) f32

    # Relayout to (tb, D, L): free leading split + batched minor-dim transpose,
    # so the softmax reduction length L is lane-dense.
    logits_t = jnp.swapaxes(logits.reshape(tb, L, D), 1, 2)           # (tb, D, L)

    # softmax over L (lane-dense exp, XLU reduce, EUP approx reciprocal).
    lmax = jnp.max(logits_t, axis=-1, keepdims=True)
    e = jnp.exp(logits_t - lmax)
    a_t = e * pl.reciprocal(jnp.sum(e, axis=-1, keepdims=True), approx=True)
    a_bf = a_t.astype(jnp.bfloat16)

    # M0[b, d, f] = sum_l A[b, l, d] * x[b, l, f]
    m0 = jax.lax.dot_general(a_bf, x, (((2,), (1,)), ((0,), (0,))),
                             preferred_element_type=jnp.float32)      # (tb, D, F) f32

    # Lane-dense writeback: collapse (D, F) -> D*F so the store / DMA is unmasked.
    m0_ref[...] = m0.reshape(tb, D * F)

    # BatchNorm per-channel (F) statistics, accumulated per core-partial.
    stats_ref[0:1, :] += jnp.sum(m0, axis=(0, 1))[None, :]
    stats_ref[1:2, :] += jnp.sum(m0 * m0, axis=(0, 1))[None, :]

    # penal contribution without materializing eye / diff:
    #   sum_b ||A_b^T A_b - I||_F^2 = sum(AAT^2) - 2*trace(A^T A) + tb*D
    aat = jax.lax.dot_general(a_bf, a_bf, (((2,), (2,)), ((0,), (0,))),
                              preferred_element_type=jnp.float32)     # (tb, D, D)
    p_part = jnp.sum(aat * aat) - 2.0 * jnp.sum(a_t * a_t) + float(tb * D)
    pen_ref[...] += p_part


# --------------------------------------------------------------------------
# Tiling / VMEM budget helpers.
# --------------------------------------------------------------------------
def _legal_tiles(B):
    # tb is the second-minor dim of the flattened (tb, D*F) output block, so it
    # must be a multiple of 8 (or equal to the full batch dim).
    return sorted({d for d in range(1, B + 1)
                   if B % d == 0 and (d % 8 == 0 or d == B)})


def _per_batch_bytes(L, F, H, D):
    return (2 * (2 * L * F)          # bf16 x block, double-buffered
            + 2 * (4 * D * F)        # f32 (tb, D*F) out block, double-buffered
            + 4 * (L * H + L * F + 4 * D * L + 2 * D * F + D * D))  # f32 intermediates


def _vmem_budgets():
    """(per-tile working-set budget, vmem_limit_bytes), generation-aware."""
    try:
        cap = int(getattr(pltpu.get_tpu_info(), "vmem_capacity_bytes",
                          64 * 1024 * 1024))
    except Exception:
        cap = 64 * 1024 * 1024
    if cap >= 96 * 1024 * 1024:
        # v5e / v6e class (128 MiB VMEM): large tiles, fewer grid steps.
        return 56 * 1024 * 1024, 100 * 1024 * 1024
    # v7x class (64 MiB physical per TensorCore): keep double-buffer headroom.
    return 24 * 1024 * 1024, 36 * 1024 * 1024


def _pick_batch_tile(B, L, F, H, D, budget_bytes):
    want = max(1, budget_bytes // max(_per_batch_bytes(L, F, H, D), 1))
    legal = _legal_tiles(B)
    fits = [t for t in legal if t <= want]
    return fits[-1] if fits else legal[0]


# --------------------------------------------------------------------------
# Wrapper.
# --------------------------------------------------------------------------
def self_attn_pallas(x, w1, w2, *, batch_tile=None):
    """x: (B, L, F) f32; w1: (H, F) = linear_1.weight; w2: (D, H) = linear_2.weight.

    Returns (M, penal) with M: (B, D, F) f32 and penal a scalar, matching the
    training-mode forward of the PyTorch SelfAttn module (default BN affine
    params gamma=1, beta=0)."""
    B, L, F = x.shape
    H = w1.shape[0]
    D = w2.shape[0]

    tile_budget, vmem_limit = _vmem_budgets()
    if batch_tile is None:
        tb = _pick_batch_tile(B, L, F, H, D, tile_budget)
    else:
        legal = _legal_tiles(B)
        fits = [t for t in legal if t <= batch_tile]
        tb = fits[-1] if fits else legal[0]

    n_tiles = B // tb
    # Leading "parallel" axis lets v7x's two TensorCores each own half the tiles
    # (per-core partial stats are reduced below); it is a no-op on 1-TC chips.
    G = 2 if (n_tiles >= 2 and n_tiles % 2 == 0) else 1
    TPC = n_tiles // G

    # Cast once here: halves the dominant HBM read of x (kernel math is bf16 MXU
    # with f32 accumulation anyway).
    x_bf = x.astype(jnp.bfloat16)
    w1_bf = w1.astype(jnp.bfloat16)
    w2_bf = w2.astype(jnp.bfloat16)

    m0_flat, stats, pen = pl.pallas_call(
        _attn_stats_kernel,
        grid=(G, TPC),
        in_specs=[
            pl.BlockSpec((tb, L, F), lambda c, i: (c * TPC + i, 0, 0)),
            pl.BlockSpec((H, F), lambda c, i: (0, 0)),
            pl.BlockSpec((D, H), lambda c, i: (0, 0)),
        ],
        out_specs=(
            pl.BlockSpec((tb, D * F), lambda c, i: (c * TPC + i, 0)),
            pl.BlockSpec((None, 2, F), lambda c, i: (c, 0, 0)),   # per-core partials
            pl.BlockSpec((None, 1, 1), lambda c, i: (c, 0, 0)),   # per-core penal
        ),
        out_shape=(
            jax.ShapeDtypeStruct((B, D * F), jnp.float32),
            jax.ShapeDtypeStruct((G, 2, F), jnp.float32),
            jax.ShapeDtypeStruct((G, 1, 1), jnp.float32),
        ),
        compiler_params=pltpu.CompilerParams(
            dimension_semantics=("parallel", "arbitrary"),
            vmem_limit_bytes=vmem_limit,
        ),
    )(x_bf, w1_bf, w2_bf)

    # XLA epilogue: combine per-core partials, form BN (mean, inv_std), apply the
    # normalization as one fused lane-dense elementwise pass, and finish penal.
    count = jnp.float32(B * D)
    ssum = jnp.sum(stats[:, 0, :], axis=0)
    ssq = jnp.sum(stats[:, 1, :], axis=0)
    mean = ssum / count
    var = ssq / count - mean * mean            # biased variance (BN training mode)
    inv_std = jax.lax.rsqrt(var + BN_EPS)
    penal = jnp.sum(pen) / B

    m0 = m0_flat.reshape(B, D, F)              # metadata-only reshape
    m = (m0 - mean[None, None, :]) * inv_std[None, None, :]

    # TODO(synk): BatchNorm1d running_mean/running_var buffer updates are
    # training-time state mutation and are not emitted; only the forward output
    # (normalized with batch statistics, default gamma=1/beta=0) is computed.
    return m, penal


# --------------------------------------------------------------------------
# Pure-JAX f32 reference mirroring the PyTorch forward (training-mode BN).
# --------------------------------------------------------------------------
def self_attn_reference(x, w1, w2):
    B = x.shape[0]
    D = w2.shape[0]
    s1 = jnp.tanh(jnp.einsum('blf,hf->blh', x, w1))
    logits = jnp.einsum('blh,dh->bld', s1, w2)
    A = jax.nn.softmax(logits, axis=1)
    M0 = jnp.einsum('bld,blf->bdf', A, x)
    mean = jnp.mean(M0, axis=(0, 1), keepdims=True)
    var = jnp.mean((M0 - mean) ** 2, axis=(0, 1), keepdims=True)
    M = (M0 - mean) / jnp.sqrt(var + BN_EPS)
    AAT = jnp.einsum('bld,ble->bde', A, A)
    diff = AAT - jnp.eye(D, dtype=x.dtype)[None]
    penal = jnp.sum(diff * diff) / B
    return M, penal


if __name__ == "__main__":
    # Small shapes consistent with the module's forward.
    B, L = 32, 64           # batch, sequence length
    F, H, D = 32, 32, 8     # feature_size, hidden_size, num_desc

    key = jax.random.PRNGKey(0)
    kx, k1, k2 = jax.random.split(key, 3)
    x = jax.random.normal(kx, (B, L, F), dtype=jnp.float32)

    # PyTorch nn.Linear default init: U(-1/sqrt(fan_in), 1/sqrt(fan_in)),
    # weights kept in native PyTorch layout (out_features, in_features).
    w1 = jax.random.uniform(k1, (H, F), dtype=jnp.float32,
                            minval=-1.0 / (F ** 0.5), maxval=1.0 / (F ** 0.5))
    w2 = jax.random.uniform(k2, (D, H), dtype=jnp.float32,
                            minval=-1.0 / (H ** 0.5), maxval=1.0 / (H ** 0.5))

    # batch_tile=8 -> 4 tiles over a (2, 2) grid, exercising both the per-core
    # "parallel" split and the cross-tile BN/penal accumulation on the inner axis.
    fwd = jax.jit(functools.partial(self_attn_pallas, batch_tile=8))
    M, penal = fwd(x, w1, w2)
    jax.block_until_ready((M, penal))

    M_ref, penal_ref = self_attn_reference(x, w1, w2)
    assert M.shape == (B, D, F)
    # bf16 MXU inputs (f32 accumulation); BatchNorm's 1/std amplifies the ~1e-3
    # mixed-precision error, so the tolerance vs the all-f32 reference is relaxed.
    assert jnp.allclose(M, M_ref, atol=5e-2, rtol=5e-2), (
        f"M mismatch: max abs err {float(jnp.max(jnp.abs(M - M_ref)))}")
    assert jnp.allclose(penal, penal_ref, atol=1e-2, rtol=1e-2), (
        f"penal mismatch: {float(penal)} vs {float(penal_ref)}")

    print("KERNEL_OK")
</pallas_src>

<mosaic_0001>
module attributes {stable_mosaic.version = 11 : i64} {
  func.func @_attn_stats_kernel(%arg0: i32, %arg1: i32, %arg2: memref<8x64x32xbf16, #tpu.memory_space<vmem>>, %arg3: memref<32x32xbf16, #tpu.memory_space<vmem>>, %arg4: memref<8x32xbf16, #tpu.memory_space<vmem>>, %arg5: memref<8x256xf32, #tpu.memory_space<vmem>>, %arg6: memref<1x2x32xf32, #tpu.memory_space<vmem>>, %arg7: memref<1x1x1xf32, #tpu.memory_space<vmem>>) attributes {dimension_semantics = [#tpu.dimension_semantics<parallel>, #tpu.dimension_semantics<arbitrary>], iteration_bounds = array<i64: 2, 2>, scalar_prefetch = 0 : i64, scratch_operands = 0 : i64, tpu.core_type = #tpu.core_type<tc>, window_params = [{transform_indices = @transform_0, window_bounds = array<i64: 8, 64, 32>}, {pipeline_mode = #tpu.pipeline_mode<synchronous>, transform_indices = @transform_1, window_bounds = array<i64: 32, 32>}, {pipeline_mode = #tpu.pipeline_mode<synchronous>, transform_indices = @transform_2, window_bounds = array<i64: 8, 32>}, {transform_indices = @transform_3, window_bounds = array<i64: 8, 256>}, {transform_indices = @transform_4, window_bounds = array<i64: 1, 2, 32>}, {transform_indices = @transform_5, window_bounds = array<i64: 1, 1, 1>}]} {
    %c0_i32 = arith.constant 0 : i32
    %0 = arith.cmpi eq, %arg1, %c0_i32 : i32
    %1 = arith.extui %0 : i1 to i32
    %c0_i32_0 = arith.constant 0 : i32
    %2 = arith.cmpi ne, %1, %c0_i32_0 : i32
    scf.if %2 {
      %cst_37 = arith.constant 0.000000e+00 : f32
      %65 = vector.broadcast %cst_37 : f32 to vector<2x32xf32>
      %c0_38 = arith.constant 0 : index
      %c0_39 = arith.constant 0 : index
      %c0_40 = arith.constant 0 : index
      %66 = vector.load %arg6[%c0_38, %c0_39, %c0_40] : memref<1x2x32xf32, #tpu.memory_space<vmem>>, vector<1x2x32xf32>
      %67 = vector.shape_cast %66 : vector<1x2x32xf32> to vector<2x32xf32>
      %68 = vector.shape_cast %65 : vector<2x32xf32> to vector<1x2x32xf32>
      tpu.vector_store %arg6[%c0_38, %c0_39, %c0_40], %68 {strides = array<i32>} : memref<1x2x32xf32, #tpu.memory_space<vmem>>, vector<1x2x32xf32>,
      %cst_41 = arith.constant 0.000000e+00 : f32
      %69 = vector.broadcast %cst_41 : f32 to vector<1x1xf32>
      %c0_42 = arith.constant 0 : index
      %c0_43 = arith.constant 0 : index
      %c0_44 = arith.constant 0 : index
      %70 = vector.load %arg7[%c0_42, %c0_43, %c0_44] : memref<1x1x1xf32, #tpu.memory_space<vmem>>, vector<1x1x1xf32>
      %71 = vector.shape_cast %70 : vector<1x1x1xf32> to vector<1x1xf32>
      %72 = vector.shape_cast %69 : vector<1x1xf32> to vector<1x1x1xf32>
      tpu.vector_store %arg7[%c0_42, %c0_43, %c0_44], %72 {strides = array<i32>} : memref<1x1x1xf32, #tpu.memory_space<vmem>>, vector<1x1x1xf32>,
    } else {
    }
    %c0 = arith.constant 0 : index
    %c0_1 = arith.constant 0 : index
    %c0_2 = arith.constant 0 : index
    %3 = vector.load %arg2[%c0, %c0_1, %c0_2] : memref<8x64x32xbf16, #tpu.memory_space<vmem>>, vector<8x64x32xbf16>
    %c0_3 = arith.constant 0 : index
    %c0_4 = arith.constant 0 : index
    %4 = vector.load %arg3[%c0_3, %c0_4] : memref<32x32xbf16, #tpu.memory_space<vmem>>, vector<32x32xbf16>
    %c0_5 = arith.constant 0 : index
    %c0_6 = arith.constant 0 : index
    %5 = vector.load %arg4[%c0_5, %c0_6] : memref<8x32xbf16, #tpu.memory_space<vmem>>, vector<8x32xbf16>
    %6 = vector.shape_cast %3 : vector<8x64x32xbf16> to vector<512x32xbf16>
    %cst = arith.constant dense<0.000000e+00> : vector<512x32xf32>
    %7 = tpu.matmul %6, %4, %cst {dimension_numbers = #tpu.dot_dimension_numbers<[1], [1], [0], [0], [0, 0, 1, 0], [], []>} : vector<512x32xbf16>, vector<32x32xbf16>, vector<512x32xf32> -> vector<512x32xf32>
    %8 = math.tanh %7 : vector<512x32xf32>
    %9 = arith.truncf %8 : vector<512x32xf32> to vector<512x32xbf16>
    %cst_7 = arith.constant dense<0.000000e+00> : vector<512x8xf32>
    %10 = tpu.matmul %9, %5, %cst_7 {dimension_numbers = #tpu.dot_dimension_numbers<[1], [1], [0], [0], [0, 0, 1, 0], [], []>} : vector<512x32xbf16>, vector<8x32xbf16>, vector<512x8xf32> -> vector<512x8xf32>
    %11 = vector.shape_cast %10 : vector<512x8xf32> to vector<8x64x8xf32>
    %12 = tpu.transpose %11, [0, 2, 1] : vector<8x64x8xf32> -> vector<8x8x64xf32>
    %cst_8 = arith.constant dense<0xFF800000> : vector<8x8xf32>
    %13 = vector.multi_reduction <maximumf>, %12, %cst_8 [2] : vector<8x8x64xf32> to vector<8x8xf32>
    %14 = vector.shape_cast %13 : vector<8x8xf32> to vector<8x8x1xf32>
    %15 = vector.broadcast %14 : vector<8x8x1xf32> to vector<8x8x64xf32>
    %16 = arith.subf %12, %15 : vector<8x8x64xf32>
    %17 = math.exp %16 : vector<8x8x64xf32>
    %cst_9 = arith.constant dense<0.000000e+00> : vector<8x8xf32>
    %18 = vector.multi_reduction <add>, %17, %cst_9 [2] : vector<8x8x64xf32> to vector<8x8xf32>
    %19 = vector.shape_cast %18 : vector<8x8xf32> to vector<8x8x1xf32>
    %20 = tpu.reciprocal %19 {approx = true} : vector<8x8x1xf32> -> vector<8x8x1xf32>
    %21 = vector.broadcast %20 : vector<8x8x1xf32> to vector<8x8x64xf32>
    %22 = arith.mulf %17, %21 : vector<8x8x64xf32>
    %23 = arith.truncf %22 : vector<8x8x64xf32> to vector<8x8x64xbf16>
    %cst_10 = arith.constant dense<0.000000e+00> : vector<8x8x32xf32>
    %24 = tpu.matmul %23, %3, %cst_10 {dimension_numbers = #tpu.dot_dimension_numbers<[2], [1], [1], [2], [0, 0, 0, 1, 1, 2], [0], [0]>} : vector<8x8x64xbf16>, vector<8x64x32xbf16>, vector<8x8x32xf32> -> vector<8x8x32xf32>
    %25 = vector.shape_cast %24 : vector<8x8x32xf32> to vector<8x256xf32>
    %c0_11 = arith.constant 0 : index
    %c0_12 = arith.constant 0 : index
    %26 = vector.load %arg5[%c0_11, %c0_12] : memref<8x256xf32, #tpu.memory_space<vmem>>, vector<8x256xf32>
    tpu.vector_store %arg5[%c0_11, %c0_12], %25 {strides = array<i32>} : memref<8x256xf32, #tpu.memory_space<vmem>>, vector<8x256xf32>,
    %c0_13 = arith.constant 0 : index
    %c0_14 = arith.constant 0 : index
    %c0_15 = arith.constant 0 : index
    %27 = vector.load %arg6[%c0_13, %c0_14, %c0_15] : memref<1x2x32xf32, #tpu.memory_space<vmem>>, vector<1x1x32xf32>
    %28 = vector.shape_cast %27 : vector<1x1x32xf32> to vector<1x32xf32>
    %cst_16 = arith.constant dense<0.000000e+00> : vector<32xf32>
    %29 = vector.multi_reduction <add>, %24, %cst_16 [0, 1] : vector<8x8x32xf32> to vector<32xf32>
    %30 = vector.shape_cast %29 : vector<32xf32> to vector<1x32xf32>
    %31 = arith.addf %28, %30 : vector<1x32xf32>
    %c0_17 = arith.constant 0 : index
    %c0_18 = arith.constant 0 : index
    %c0_19 = arith.constant 0 : index
    %32 = vector.load %arg6[%c0_17, %c0_18, %c0_19] : memref<1x2x32xf32, #tpu.memory_space<vmem>>, vector<1x1x32xf32>
    %33 = vector.shape_cast %32 : vector<1x1x32xf32> to vector<1x32xf32>
    %34 = vector.shape_cast %31 : vector<1x32xf32> to vector<1x1x32xf32>
    tpu.vector_store %arg6[%c0_17, %c0_18, %c0_19], %34 {strides = array<i32>} : memref<1x2x32xf32, #tpu.memory_space<vmem>>, vector<1x1x32xf32>,
    %c0_20 = arith.constant 0 : index
    %c1 = arith.constant 1 : index
    %c0_21 = arith.constant 0 : index
    %35 = vector.load %arg6[%c0_20, %c1, %c0_21] : memref<1x2x32xf32, #tpu.memory_space<vmem>>, vector<1x1x32xf32>
    %36 = vector.shape_cast %35 : vector<1x1x32xf32> to vector<1x32xf32>
    %37 = arith.mulf %24, %24 : vector<8x8x32xf32>
    %cst_22 = arith.constant dense<0.000000e+00> : vector<32xf32>
    %38 = vector.multi_reduction <add>, %37, %cst_22 [0, 1] : vector<8x8x32xf32> to vector<32xf32>
    %39 = vector.shape_cast %38 : vector<32xf32> to vector<1x32xf32>
    %40 = arith.addf %36, %39 : vector<1x32xf32>
    %c0_23 = arith.constant 0 : index
    %c1_24 = arith.constant 1 : index
    %c0_25 = arith.constant 0 : index
    %41 = vector.load %arg6[%c0_23, %c1_24, %c0_25] : memref<1x2x32xf32, #tpu.memory_space<vmem>>, vector<1x1x32xf32>
    %42 = vector.shape_cast %41 : vector<1x1x32xf32> to vector<1x32xf32>
    %43 = vector.shape_cast %40 : vector<1x32xf32> to vector<1x1x32xf32>
    tpu.vector_store %arg6[%c0_23, %c1_24, %c0_25], %43 {strides = array<i32>} : memref<1x2x32xf32, #tpu.memory_space<vmem>>, vector<1x1x32xf32>,
    %cst_26 = arith.constant dense<0.000000e+00> : vector<8x8x8xf32>
    %44 = tpu.matmul %23, %23, %cst_26 {dimension_numbers = #tpu.dot_dimension_numbers<[2], [2], [1], [1], [0, 0, 0, 1, 1, 1], [0], [0]>} : vector<8x8x64xbf16>, vector<8x8x64xbf16>, vector<8x8x8xf32> -> vector<8x8x8xf32>
    %45 = arith.mulf %44, %44 : vector<8x8x8xf32>
    %46 = vector.shape_cast %45 : vector<8x8x8xf32> to vector<1x8x8x8xf32>
    %cst_27 = arith.constant dense<0.000000e+00> : vector<1xf32>
    %47 = vector.multi_reduction <add>, %46, %cst_27 [1, 2, 3] : vector<1x8x8x8xf32> to vector<1xf32>
    %48 = vector.shape_cast %47 : vector<1xf32> to vector<1x1x1x1xf32>
    %49 = vector.extract %48[0, 0, 0, 0] : f32 from vector<1x1x1x1xf32>
    %50 = arith.mulf %22, %22 : vector<8x8x64xf32>
    %51 = vector.shape_cast %50 : vector<8x8x64xf32> to vector<1x8x8x64xf32>
    %cst_28 = arith.constant dense<0.000000e+00> : vector<1xf32>
    %52 = vector.multi_reduction <add>, %51, %cst_28 [1, 2, 3] : vector<1x8x8x64xf32> to vector<1xf32>
    %53 = vector.shape_cast %52 : vector<1xf32> to vector<1x1x1x1xf32>
    %54 = vector.extract %53[0, 0, 0, 0] : f32 from vector<1x1x1x1xf32>
    %cst_29 = arith.constant 2.000000e+00 : f32
    %55 = arith.mulf %cst_29, %54 : f32
    %56 = arith.subf %49, %55 : f32
    %cst_30 = arith.constant 6.400000e+01 : f32
    %57 = arith.addf %56, %cst_30 : f32
    %c0_31 = arith.constant 0 : index
    %c0_32 = arith.constant 0 : index
    %c0_33 = arith.constant 0 : index
    %58 = vector.load %arg7[%c0_31, %c0_32, %c0_33] : memref<1x1x1xf32, #tpu.memory_space<vmem>>, vector<1x1x1xf32>
    %59 = vector.shape_cast %58 : vector<1x1x1xf32> to vector<1x1xf32>
    %60 = vector.broadcast %57 : f32 to vector<1x1xf32>
    %61 = arith.addf %59, %60 : vector<1x1xf32>
    %c0_34 = arith.constant 0 : index
    %c0_35 = arith.constant 0 : index
    %c0_36 = arith.constant 0 : index
    %62 = vector.load %arg7[%c0_34, %c0_35, %c0_36] : memref<1x1x1xf32, #tpu.memory_space<vmem>>, vector<1x1x1xf32>
    %63 = vector.shape_cast %62 : vector<1x1x1xf32> to vector<1x1xf32>
    %64 = vector.shape_cast %61 : vector<1x1xf32> to vector<1x1x1xf32>
    tpu.vector_store %arg7[%c0_34, %c0_35, %c0_36], %64 {strides = array<i32>} : memref<1x1x1xf32, #tpu.memory_space<vmem>>, vector<1x1x1xf32>,
    return
  }
  func.func @transform_0(%arg0: i32, %arg1: i32) -> (i32, i32, i32) {
    %c2_i32 = arith.constant 2 : i32
    %0 = arith.muli %arg0, %c2_i32 : i32
    %1 = arith.addi %0, %arg1 : i32
    %c0_i32 = arith.constant 0 : i32
    %c0_i32_0 = arith.constant 0 : i32
    %c0_i32_1 = arith.constant 0 : i32
    return %1, %c0_i32, %c0_i32_0 : i32, i32, i32
  }
  func.func @transform_1(%arg0: i32, %arg1: i32) -> (i32, i32) {
    %c0_i32 = arith.constant 0 : i32
    %c0_i32_0 = arith.constant 0 : i32
    %c0_i32_1 = arith.constant 0 : i32
    return %c0_i32, %c0_i32_0 : i32, i32
  }
  func.func @transform_2(%arg0: i32, %arg1: i32) -> (i32, i32) {
    %c0_i32 = arith.constant 0 : i32
    %c0_i32_0 = arith.constant 0 : i32
    %c0_i32_1 = arith.constant 0 : i32
    return %c0_i32, %c0_i32_0 : i32, i32
  }
  func.func @transform_3(%arg0: i32, %arg1: i32) -> (i32, i32) {
    %c2_i32 = arith.constant 2 : i32
    %0 = arith.muli %arg0, %c2_i32 : i32
    %1 = arith.addi %0, %arg1 : i32
    %c0_i32 = arith.constant 0 : i32
    %c0_i32_0 = arith.constant 0 : i32
    return %1, %c0_i32 : i32, i32
  }
  func.func @transform_4(%arg0: i32, %arg1: i32) -> (i32, i32, i32) {
    %c0_i32 = arith.constant 0 : i32
    %c0_i32_0 = arith.constant 0 : i32
    %c0_i32_1 = arith.constant 0 : i32
    return %arg0, %c0_i32, %c0_i32_0 : i32, i32, i32
  }
  func.func @transform_5(%arg0: i32, %arg1: i32) -> (i32, i32, i32) {
    %c0_i32 = arith.constant 0 : i32
    %c0_i32_0 = arith.constant 0 : i32
    %c0_i32_1 = arith.constant 0 : i32
    return %arg0, %c0_i32, %c0_i32_0 : i32, i32, i32
  }
}

</mosaic_0001>

<bundles_post_ra>
// kernel: self_attn_pallas.1
= control target key start
LH: loop header
LB: loop body
LE: loop exit
PB: predicated region body
PF: predicated region fallthrough
CT: control target
= control target key end

     0   :  { %s3778_s18 = smov 0   ;;  %s3780_s19 = smov 0   ;;  %s4317_s0 = inlined_call_operand.vmem [shape: bf16[32,64,32], index: 0, kind: input, shape index: {}]   ;;  %s4318_s1 = inlined_call_operand.vmem [shape: bf16[32,32], index: 1, kind: input, shape index: {}]   ;;  %s4319_s2 = inlined_call_operand.vmem [shape: bf16[8,32], index: 2, kind: input, shape index: {}]   ;;  %s4320_s3 = inlined_call_operand.vmem [shape: f32[32,256], index: 3, kind: output, shape index: {0}]   ;;  %s4321_s4 = inlined_call_operand.vmem [shape: f32[2,2,32], index: 4, kind: output, shape index: {1}]   ;;  %s4322_s5 = inlined_call_operand.vmem [shape: f32[2,1,1], index: 5, kind: output, shape index: {2}]  }
   0x1   :  { %s3782_s20 = smov 0   ;;  %s3784_s21 = smov 0  }
   0x2   :  { %s3786_s22 = smov 0  }
   0x3 LB: > { %s25_s23 = sadd.s32 1, %s3730_s20  ;;  %s28_s24 = sadd.s32 1, %s3734_s21  ;;  %s3738_s22 = sphi %s3786_s22, %s16_s22   ;;  %s3734_s21 = sphi %s3784_s21, %s4326_s21   ;;  %s3730_s20 = sphi %s3782_s20, %s4325_s20   ;;  %s3726_s19 = sphi %s3780_s19, %s4324_s19   ;;  %s3722_s18 = sphi %s3778_s18, %s4323_s18  }
   0x4   : > { %p26_p0 = scmp.ge.s32.totalorder %s25_s23, 2  ;;  %p2894_p1 = scmp.ge.s32.totalorder %s3738_s22, 1 }
   0x5   : > { %p218_p2 = scmp.lt.s32.totalorder %s3738_s22, 5 }
   0x6   : > { %s4328_s23 = smov (%p26_p0, %s25_s23), 0  ;;  %s4330_s24 = smov (!%p26_p0, %s28_s24), %s3734_s21 }
   0x7   : > { %p219_p3 = pnand %p2894_p1, %p218_p2  ;;  %p30_p4 = scmp.ge.s32.totalorder %s4330_s24, 2 }
   0x8   : > { %s2895_s25 = sshll.u32 (!%p219_p3), %s3726_s19, 1  ;;  %p278_p7 = scmp.lt.s32.totalorder (!%p219_p3), %s3726_s19, 1 }
   0x9   : > { %s4332_s24 = smov (%p30_p4, %s4330_s24), 0  ;;  %222 = sbr.rel (%p219_p3) target bundleno = 1601 (0x641), region = 32 }
   0xa   : > { %s259_s26 = sadd.s32 (!%p219_p3), %s3722_s18, %s2895_s25  ;;  %p2903_p8 = scmp.ne.s32.totalorder (!%p219_p3), %s3722_s18, 0 }
   0xb   : > { %s2896_s27 = sshll.u32 (!%p219_p3), %s259_s26, 3  ;;  %p271_p5 = scmp.lt.s32.totalorder (!%p219_p3), %s259_s26, 3 }
   0xc   : > { %p261_p6 = scmp.lt.s32.totalorder (!%p219_p3), %s2896_s27, 31 }
  0x10   : > { %s4334_s26 = smov (!%p271_p5, %s259_s26), 3  ;;  %s4336_s27 = smov (!%p261_p6, %s2896_s27), 31 }
  0x11   : > { %s3021_s28 = sshll.u32 %s4334_s26, 4  ;;  %s3020_s29 = sshll.u32 %s4336_s27, 5  ;;  %vm290_vm0 = vcmask (!%p2903_p8), 254976   ;;  %vm292_vm1 = vcmask (!%p2903_p8), 0   ;;  %v3740_v0 = vmov (!%p2903_p8), 0.0  }
  0x12   : > { %s3814_s7 = scalar_lea.vmem %s4320_s3, %s3021_s28  ;;  %s3819_s10 = scalar_lea.vmem %s4317_s0, %s3020_s29 }
  0x13   : > { %s4338_s19 = smov (!%p278_p7, %s3726_s19), 1  ;;  %289 = sbr.rel (%p2903_p8) target bundleno = 26 (0x1a), region = 36 }
  0x14   : > { %s2902_s11 = sshll.u32 %s4338_s19, 1  ;;  %s3824_s14 = scalar_lea.vmem %s4322_s5, %s4338_s19 }
  0x15   : > { %s3829_s17 = scalar_lea.vmem %s4321_s4, %s2902_s11  ;;  %293 = vst.msk [vmem:[%s3824_s14] sm:$0x1] (!%p2903_p8), %vm292_vm1, %v3740_v0 }
  0x16   : > { %291 = vst.msk [vmem:[%s3829_s17] sm:$0x3] (!%p2903_p8), %vm290_vm0, %v3740_v0 }
  0x1a PF: > { %v3478_v1 = vld [vmem:[%s4318_s1] sm:$0xff]   ;;  %vm533_vm2 = vcmask 261120   ;;  %v3479_v2 = vld [vmem:[%s4318_s1 + $0x8] sm:$0xff]   ;;  %v3482_v7 = vld [vmem:[%s3819_s10 + $0x10] sm:$0xff]   ;;  %vm1665_vm3 = vcmask 523264   ;;  %vm3742_vm4 = vmmov 0  }
  0x1b   : > { %3423 = vmatprep.subr.msk.bf16.mxu0 %vm533_vm2, %v3478_v1  ;;  %v631_v3 = vsel %vm533_vm2, %v3478_v1, 0  ;;  %v3480_v4 = vld [vmem:[%s3819_s10] sm:$0xff]   ;;  %v634_v5 = vsel %vm533_vm2, %v3479_v2, 0  ;;  %v3481_v6 = vld [vmem:[%s3819_s10 + $0x8] sm:$0xff]   ;;  %v3483_v8 = vld [vmem:[%s3819_s10 + $0x18] sm:$0xff]   ;;  %vm2692_vm5 = vcmask 64512  }
  0x1c   : > { %3146 = vmatpush3.bf16.xpose.msra.mxu0 %v631_v3  ;;  %3149 = vmatprep.mubr.msk.bf16.mxu0 %vm533_vm2, %v3480_v4  ;;  %v3852_v9 = vld [vmem:[%s3819_s10 + $0x20] sm:$0xff]   ;;  %v3858_v10 = vld [vmem:[%s3819_s10 + $0x28] sm:$0xff]   ;;  %v3861_v11 = vld [vmem:[%s3819_s10 + $0x30] sm:$0xff]   ;;  %s3745_s29 = smov 32   ;;  %vm2330_vm6 = vcmask 253952   ;;  %s3746_s30 = smov 64  }
  0x1d   : > { %3424 = vmatprep.subr.msk.bf16.mxu0 %vm533_vm2, %v3479_v2  ;;  %v3868_v12 = vld [vmem:[%s3819_s10 + $0x38] sm:$0xff]   ;;  %v3488_v13 = vld [vmem:[%s3819_s10 + $0x40] sm:$0xff]   ;;  %v3489_v14 = vld [vmem:[%s3819_s10 + $0x48] sm:$0xff]   ;;  %s3747_s6 = smov 96   ;;  %vm2300_vm7 = vcmask 785408   ;;  %vm2755_vm8 = vcmask 0  }
  0x1e   : > { %v3490_v15 = vld [vmem:[%s3819_s10 + $0x50] sm:$0xff]   ;;  %v3491_v16 = vld [vmem:[%s3819_s10 + $0x58] sm:$0xff]   ;;  %v3492_v17 = vld [vmem:[%s3819_s10 + $0x60] sm:$0xff]  }
  0x1f   : > { %v3493_v18 = vld [vmem:[%s3819_s10 + $0x68] sm:$0xff]   ;;  %v3494_v19 = vld [vmem:[%s3819_s10 + $0x70] sm:$0xff]   ;;  %v3495_v20 = vld [vmem:[%s3819_s10 + $0x78] sm:$0xff]  }
  0x20   : > { %v3496_v21 = vld [vmem:[%s3819_s10 + $0x80] sm:$0xff]   ;;  %v3497_v22 = vld [vmem:[%s3819_s10 + $0x88] sm:$0xff]   ;;  %v3498_v23 = vld [vmem:[%s3819_s10 + $0x90] sm:$0xff]  }
  0x21   : > { %v3499_v24 = vld [vmem:[%s3819_s10 + $0x98] sm:$0xff]   ;;  %v3500_v25 = vld [vmem:[%s3819_s10 + $0xa0] sm:$0xff]   ;;  %v3501_v26 = vld [vmem:[%s3819_s10 + $0xa8] sm:$0xff]  }
  0x22   : > { %v3502_v27 = vld [vmem:[%s3819_s10 + $0xb0] sm:$0xff]   ;;  %v3503_v28 = vld [vmem:[%s3819_s10 + $0xb8] sm:$0xff]   ;;  %v3504_v29 = vld [vmem:[%s3819_s10 + $0xc0] sm:$0xff]  }
  0x23   : > { %v3505_v30 = vld [vmem:[%s3819_s10 + $0xc8] sm:$0xff]   ;;  %v362_v31 = vld [vmem:[%s4319_s2] sm:$0xf]  ;;  %v3506_v32 = vld [vmem:[%s3819_s10 + $0xd0] sm:$0xff]  }
  0x24   : > { %3148 = vmatpush3.bf16.xpose.msra.mxu0 %v634_v5  ;;  %3425 = vmatprep.subr.msk.bf16.mxu1 %vm533_vm2, %v362_v31  ;;  %v1118_v33 = vsel %vm533_vm2, %v362_v31, 0  ;;  %v3507_v34 = vld [vmem:[%s3819_s10 + $0xd8] sm:$0xff]   ;;  %v3508_v35 = vld [vmem:[%s3819_s10 + $0xe0] sm:$0xff]   ;;  %v3509_v36 = vld [vmem:[%s3819_s10 + $0xe8] sm:$0xff]  }
  0x25   : > { %3214 = vmatpush3.bf16.xpose.msra.mxu1 %v1118_v33  ;;  %v3510_v37 = vld [vmem:[%s3819_s10 + $0xf0] sm:$0xff]   ;;  %v3511_v38 = vld [vmem:[%s3819_s10 + $0xf8] sm:$0xff]  }
  0x2b   : > { %3150 = vmatmul.mubr.msk.bf16.vlgmr.msra.gmra.mrb[0].mxu0 %vm533_vm2, %v3481_v6 }
  0x2c   : > { %3153 = vmatprep.mubr.msk.bf16.mxu0 %vm533_vm2, %v3482_v7 }
  0x33   : > { %3154 = vmatmul.mubr.msk.bf16.gmra.mrb[4].mxu0 %vm533_vm2, %v3483_v8 }
  0x34   : > { %3157 = vmatprep.mubr.msk.bf16.mxu0 %vm533_vm2, %v3852_v9 }
  0x3b   : > { %3158 = vmatmul.mubr.msk.bf16.gmra.mrb[8].mxu0 %vm533_vm2, %v3858_v10 }
  0x3c   : > { %3161 = vmatprep.mubr.msk.bf16.mxu0 %vm533_vm2, %v3861_v11 }
  0x43   : > { %3162 = vmatmul.mubr.msk.bf16.gmra.mrb[12].mxu0 %vm533_vm2, %v3868_v12 }
  0x44   : > { %3165 = vmatprep.mubr.msk.bf16.mxu0 %vm533_vm2, %v3488_v13 }
  0x4b   : > { %3166 = vmatmul.mubr.msk.bf16.gmra.mrb[16].mxu0 %vm533_vm2, %v3489_v14 }
  0x4c   : > { %3169 = vmatprep.mubr.msk.bf16.mxu0 %vm533_vm2, %v3490_v15 }
  0x53   : > { %3170 = vmatmul.mubr.msk.bf16.gmra.mrb[20].mxu0 %vm533_vm2, %v3491_v16 }
  0x54   : > { %3173 = vmatprep.mubr.msk.bf16.mxu0 %vm533_vm2, %v3492_v17 }
  0x5b   : > { %3174 = vmatmul.mubr.msk.bf16.gmra.mrb[24].mxu0 %vm533_vm2, %v3493_v18 }
  0x5c   : > { %3177 = vmatprep.mubr.msk.bf16.mxu0 %vm533_vm2, %v3494_v19 }
  0x63   : > { %3178 = vmatmul.mubr.msk.bf16.gmra.mrb[28].mxu0 %vm533_vm2, %v3495_v20 }
  0x64   : > { %3181 = vmatprep.mubr.msk.bf16.mxu0 %vm533_vm2, %v3496_v21 }
  0x6b   : > { %3182 = vmatmul.mubr.msk.bf16.gmra.mrb[32].mxu0 %vm533_vm2, %v3497_v22 }
  0x6c   : > { %3185 = vmatprep.mubr.msk.bf16.mxu0 %vm533_vm2, %v3498_v23 }
  0x73   : > { %3186 = vmatmul.mubr.msk.bf16.gmra.mrb[36].mxu0 %vm533_vm2, %v3499_v24 }
  0x74   : > { %3189 = vmatprep.mubr.msk.bf16.mxu0 %vm533_vm2, %v3500_v25 }
  0x7b   : > { %3190 = vmatmul.mubr.msk.bf16.gmra.mrb[40].mxu0 %vm533_vm2, %v3501_v26 }
  0x7c   : > { %3193 = vmatprep.mubr.msk.bf16.mxu0 %vm533_vm2, %v3502_v27 }
  0x83   : > { %3194 = vmatmul.mubr.msk.bf16.gmra.mrb[44].mxu0 %vm533_vm2, %v3503_v28 }
  0x84   : > { %3197 = vmatprep.mubr.msk.bf16.mxu0 %vm533_vm2, %v3504_v29 }
  0x8b   : > { %3198 = vmatmul.mubr.msk.bf16.gmra.mrb[48].mxu0 %vm533_vm2, %v3505_v30 }
  0x8c   : > { %3201 = vmatprep.mubr.msk.bf16.mxu0 %vm533_vm2, %v3506_v32 }
  0x93   : > { %3202 = vmatmul.mubr.msk.bf16.gmra.mrb[52].mxu0 %vm533_vm2, %v3507_v34 }
  0x94   : > { %3205 = vmatprep.mubr.msk.bf16.mxu0 %vm533_vm2, %v3508_v35 }
  0x9b   : > { %3206 = vmatmul.mubr.msk.bf16.gmra.mrb[56].mxu0 %vm533_vm2, %v3509_v36 }
  0x9c   : > { %3209 = vmatprep.mubr.msk.bf16.mxu0 %vm533_vm2, %v3510_v37 }
  0xa3   : > { %3210 = vmatmul.mubr.msk.bf16.gmra.mrb[60].mxu0 %vm533_vm2, %v3511_v38 }
  0xfe   : > { %v3151_v39 = vpop.f32.mrb[0].mxu0 }
  0xff   : > { %3512 = vtanh.f32 %v3151_v39  ;;  %v670_v40 = vpop.f32.mrb[1].mxu0 }
 0x100   : > { %3514 = vtanh.f32 %v670_v40  ;;  %v3152_v41 = vpop.f32.mrb[2].mxu0 }
 0x101   : > { %3516 = vtanh.f32 %v3152_v41  ;;  %v673_v42 = vpop.f32.mrb[3].mxu0 }
 0x102   : > { %3518 = vtanh.f32 %v673_v42 }
 0x106   : > { %v3155_v43 = vpop.f32.mrb[4].mxu0 }
 0x107   : > { %3520 = vtanh.f32 %v3155_v43  ;;  %v686_v44 = vpop.f32.mrb[5].mxu0 }
 0x108   : > { %3522 = vtanh.f32 %v686_v44  ;;  %v3156_v45 = vpop.f32.mrb[6].mxu0 }
 0x109   : > { %v3513_v46 = vpop.eup %3512  ;;  %3524 = vtanh.f32 %v3156_v45  ;;  %v689_v47 = vpop.f32.mrb[7].mxu0 }
 0x10a   : > { %v3515_v48 = vpop.eup %3514  ;;  %3526 = vtanh.f32 %v689_v47 }
 0x10b   : > { %v3517_v49 = vpop.eup %3516 }
 0x10c   : > { %v3519_v50 = vpop.eup %3518  ;;  %v990_v51 = vpack.c.bf16 %v3517_v49, %v3513_v46 }
 0x10d   : > { %v989_v52 = vpack.c.bf16 %v3519_v50, %v3515_v48 }
 0x10e   : > { %v3159_v53 = vpop.f32.mrb[8].mxu0 }
 0x10f   : > { %3528 = vtanh.f32 %v3159_v53  ;;  %v702_v54 = vpop.f32.mrb[9].mxu0  ;;  %3215 = vmatprep.mubr.msk.bf16.mxu1 %vm533_vm2, %v989_v52 }
 0x110   : > { %3530 = vtanh.f32 %v702_v54  ;;  %v3160_v55 = vpop.f32.mrb[10].mxu0  ;;  %3216 = vmatmul.mubr.msk.bf16.vlgmr.msra.gmra.mrb[0].mxu1 %vm533_vm2, %v990_v51 }
 0x111   : > { %v3521_v56 = vpop.eup %3520  ;;  %3532 = vtanh.f32 %v3160_v55  ;;  %v705_v57 = vpop.f32.mrb[11].mxu0 }
 0x112   : > { %v3523_v58 = vpop.eup %3522  ;;  %3534 = vtanh.f32 %v705_v57 }
 0x113   : > { %v3525_v59 = vpop.eup %3524 }
 0x114   : > { %v3527_v60 = vpop.eup %3526  ;;  %v992_v61 = vpack.c.bf16 %v3525_v59, %v3521_v56 }
 0x115   : > { %v991_v62 = vpack.c.bf16 %v3527_v60, %v3523_v58 }
 0x116   : > { %v3163_v63 = vpop.f32.mrb[12].mxu0 }
 0x117   : > { %3536 = vtanh.f32 %v3163_v63  ;;  %v718_v0 = vpop.f32.mrb[13].mxu0  ;;  %3219 = vmatprep.mubr.msk.bf16.mxu1 %vm533_vm2, %v991_v62 }
 0x118   : > { %3538 = vtanh.f32 %v718_v0  ;;  %v3164_v1 = vpop.f32.mrb[14].mxu0  ;;  %3220 = vmatmul.mubr.msk.bf16.gmra.mrb[4].mxu1 %vm533_vm2, %v992_v61 }
 0x119   : > { %v3529_v2 = vpop.eup %3528  ;;  %3540 = vtanh.f32 %v3164_v1  ;;  %v721_v3 = vpop.f32.mrb[15].mxu0 }
 0x11a   : > { %v3531_v4 = vpop.eup %3530  ;;  %3542 = vtanh.f32 %v721_v3 }
 0x11b   : > { %v3533_v5 = vpop.eup %3532 }
 0x11c   : > { %v3535_v6 = vpop.eup %3534  ;;  %v994_v7 = vpack.c.bf16 %v3533_v5, %v3529_v2 }
 0x11d   : > { %v993_v8 = vpack.c.bf16 %v3535_v6, %v3531_v4 }
 0x11e   : > { %v3167_v13 = vpop.f32.mrb[16].mxu0 }
 0x11f   : > { %3544 = vtanh.f32 %v3167_v13  ;;  %v734_v14 = vpop.f32.mrb[17].mxu0  ;;  %3223 = vmatprep.mubr.msk.bf16.mxu1 %vm533_vm2, %v993_v8 }
 0x120   : > { %3546 = vtanh.f32 %v734_v14  ;;  %v3168_v15 = vpop.f32.mrb[18].mxu0  ;;  %3224 = vmatmul.mubr.msk.bf16.gmra.mrb[8].mxu1 %vm533_vm2, %v994_v7 }
 0x121   : > { %v3537_v16 = vpop.eup %3536  ;;  %3548 = vtanh.f32 %v3168_v15  ;;  %v737_v17 = vpop.f32.mrb[19].mxu0 }
 0x122   : > { %v3539_v18 = vpop.eup %3538  ;;  %3550 = vtanh.f32 %v737_v17 }
 0x123   : > { %v3541_v19 = vpop.eup %3540 }
 0x124   : > { %v3543_v20 = vpop.eup %3542  ;;  %v996_v21 = vpack.c.bf16 %v3541_v19, %v3537_v16 }
 0x125   : > { %v995_v22 = vpack.c.bf16 %v3543_v20, %v3539_v18 }
 0x126   : > { %v3171_v23 = vpop.f32.mrb[20].mxu0 }
 0x127   : > { %3552 = vtanh.f32 %v3171_v23  ;;  %v750_v24 = vpop.f32.mrb[21].mxu0  ;;  %3227 = vmatprep.mubr.msk.bf16.mxu1 %vm533_vm2, %v995_v22 }
 0x128   : > { %3554 = vtanh.f32 %v750_v24  ;;  %v3172_v25 = vpop.f32.mrb[22].mxu0  ;;  %3228 = vmatmul.mubr.msk.bf16.gmra.mrb[12].mxu1 %vm533_vm2, %v996_v21 }
 0x129   : > { %v3545_v26 = vpop.eup %3544  ;;  %3556 = vtanh.f32 %v3172_v25  ;;  %v753_v27 = vpop.f32.mrb[23].mxu0 }
 0x12a   : > { %v3547_v28 = vpop.eup %3546  ;;  %3558 = vtanh.f32 %v753_v27 }
 0x12b   : > { %v3549_v29 = vpop.eup %3548 }
 0x12c   : > { %v3551_v30 = vpop.eup %3550  ;;  %v998_v31 = vpack.c.bf16 %v3549_v29, %v3545_v26 }
 0x12d   : > { %v997_v32 = vpack.c.bf16 %v3551_v30, %v3547_v28 }
 0x12e   : > { %v3175_v33 = vpop.f32.mrb[24].mxu0 }
 0x12f   : > { %3560 = vtanh.f32 %v3175_v33  ;;  %v766_v34 = vpop.f32.mrb[25].mxu0  ;;  %3231 = vmatprep.mubr.msk.bf16.mxu1 %vm533_vm2, %v997_v32 }
 0x130   : > { %3562 = vtanh.f32 %v766_v34  ;;  %v3176_v35 = vpop.f32.mrb[26].mxu0  ;;  %3232 = vmatmul.mubr.msk.bf16.gmra.mrb[16].mxu1 %vm533_vm2, %v998_v31 }
 0x131   : > { %v3553_v36 = vpop.eup %3552  ;;  %3564 = vtanh.f32 %v3176_v35  ;;  %v769_v37 = vpop.f32.mrb[27].mxu0 }
 0x132   : > { %v3555_v38 = vpop.eup %3554  ;;  %3566 = vtanh.f32 %v769_v37 }
 0x133   : > { %v3557_v39 = vpop.eup %3556 }
 0x134   : > { %v3559_v40 = vpop.eup %3558  ;;  %v1000_v41 = vpack.c.bf16 %v3557_v39, %v3553_v36 }
 0x135   : > { %v999_v42 = vpack.c.bf16 %v3559_v40, %v3555_v38 }
 0x136   : > { %v3179_v43 = vpop.f32.mrb[28].mxu0 }
 0x137   : > { %3568 = vtanh.f32 %v3179_v43  ;;  %v782_v44 = vpop.f32.mrb[29].mxu0  ;;  %3235 = vmatprep.mubr.msk.bf16.mxu1 %vm533_vm2, %v999_v42 }
 0x138   : > { %3570 = vtanh.f32 %v782_v44  ;;  %v3180_v45 = vpop.f32.mrb[30].mxu0  ;;  %3236 = vmatmul.mubr.msk.bf16.gmra.mrb[20].mxu1 %vm533_vm2, %v1000_v41 }
 0x139   : > { %v3561_v46 = vpop.eup %3560  ;;  %3572 = vtanh.f32 %v3180_v45  ;;  %v785_v47 = vpop.f32.mrb[31].mxu0 }
 0x13a   : > { %v3563_v48 = vpop.eup %3562  ;;  %3574 = vtanh.f32 %v785_v47 }
 0x13b   : > { %v3565_v49 = vpop.eup %3564 }
 0x13c   : > { %v3567_v50 = vpop.eup %3566  ;;  %v1002_v51 = vpack.c.bf16 %v3565_v49, %v3561_v46 }
 0x13d   : > { %v1001_v52 = vpack.c.bf16 %v3567_v50, %v3563_v48 }
 0x13e   : > { %v3183_v53 = vpop.f32.mrb[32].mxu0 }
 0x13f   : > { %3576 = vtanh.f32 %v3183_v53  ;;  %v798_v54 = vpop.f32.mrb[33].mxu0  ;;  %3239 = vmatprep.mubr.msk.bf16.mxu1 %vm533_vm2, %v1001_v52 }
 0x140   : > { %3578 = vtanh.f32 %v798_v54  ;;  %v3184_v55 = vpop.f32.mrb[34].mxu0  ;;  %3240 = vmatmul.mubr.msk.bf16.gmra.mrb[24].mxu1 %vm533_vm2, %v1002_v51 }
 0x141   : > { %v3569_v56 = vpop.eup %3568  ;;  %3580 = vtanh.f32 %v3184_v55  ;;  %v801_v57 = vpop.f32.mrb[35].mxu0 }
 0x142   : > { %v3571_v58 = vpop.eup %3570  ;;  %3582 = vtanh.f32 %v801_v57 }
 0x143   : > { %v3573_v59 = vpop.eup %3572 }
 0x144   : > { %v3575_v60 = vpop.eup %3574  ;;  %v1004_v61 = vpack.c.bf16 %v3573_v59, %v3569_v56 }
 0x145   : > { %v1003_v62 = vpack.c.bf16 %v3575_v60, %v3571_v58 }
 0x146   : > { %v3187_v63 = vpop.f32.mrb[36].mxu0 }
 0x147   : > { %3584 = vtanh.f32 %v3187_v63  ;;  %v814_v0 = vpop.f32.mrb[37].mxu0  ;;  %3243 = vmatprep.mubr.msk.bf16.mxu1 %vm533_vm2, %v1003_v62 }
 0x148   : > { %3586 = vtanh.f32 %v814_v0  ;;  %v3188_v1 = vpop.f32.mrb[38].mxu0  ;;  %3244 = vmatmul.mubr.msk.bf16.gmra.mrb[28].mxu1 %vm533_vm2, %v1004_v61 }
 0x149   : > { %v3577_v2 = vpop.eup %3576  ;;  %3588 = vtanh.f32 %v3188_v1  ;;  %v817_v3 = vpop.f32.mrb[39].mxu0 }
 0x14a   : > { %v3579_v4 = vpop.eup %3578  ;;  %3590 = vtanh.f32 %v817_v3 }
 0x14b   : > { %v3581_v5 = vpop.eup %3580 }
 0x14c   : > { %v3583_v6 = vpop.eup %3582  ;;  %v1006_v7 = vpack.c.bf16 %v3581_v5, %v3577_v2 }
 0x14d   : > { %v1005_v8 = vpack.c.bf16 %v3583_v6, %v3579_v4 }
 0x14e   : > { %v3191_v13 = vpop.f32.mrb[40].mxu0 }
 0x14f   : > { %3592 = vtanh.f32 %v3191_v13  ;;  %v830_v14 = vpop.f32.mrb[41].mxu0  ;;  %3247 = vmatprep.mubr.msk.bf16.mxu1 %vm533_vm2, %v1005_v8 }
 0x150   : > { %3594 = vtanh.f32 %v830_v14  ;;  %v3192_v15 = vpop.f32.mrb[42].mxu0  ;;  %3248 = vmatmul.mubr.msk.bf16.gmra.mrb[32].mxu1 %vm533_vm2, %v1006_v7 }
 0x151   : > { %v3585_v16 = vpop.eup %3584  ;;  %3596 = vtanh.f32 %v3192_v15  ;;  %v833_v17 = vpop.f32.mrb[43].mxu0 }
 0x152   : > { %v3587_v18 = vpop.eup %3586  ;;  %3598 = vtanh.f32 %v833_v17 }
 0x153   : > { %v3589_v19 = vpop.eup %3588 }
 0x154   : > { %v3591_v20 = vpop.eup %3590  ;;  %v1008_v21 = vpack.c.bf16 %v3589_v19, %v3585_v16 }
 0x155   : > { %v1007_v22 = vpack.c.bf16 %v3591_v20, %v3587_v18 }
 0x156   : > { %v3195_v23 = vpop.f32.mrb[44].mxu0 }
 0x157   : > { %3251 = vmatprep.mubr.msk.bf16.mxu1 %vm533_vm2, %v1007_v22  ;;  %3600 = vtanh.f32 %v3195_v23  ;;  %v846_v24 = vpop.f32.mrb[45].mxu0 }
 0x158   : > { %3252 = vmatmul.mubr.msk.bf16.gmra.mrb[36].mxu1 %vm533_vm2, %v1008_v21  ;;  %3602 = vtanh.f32 %v846_v24  ;;  %v3196_v25 = vpop.f32.mrb[46].mxu0 }
 0x159   : > { %v3593_v26 = vpop.eup %3592  ;;  %3604 = vtanh.f32 %v3196_v25  ;;  %v849_v27 = vpop.f32.mrb[47].mxu0 }
 0x15a   : > { %v3595_v28 = vpop.eup %3594  ;;  %3606 = vtanh.f32 %v849_v27 }
 0x15b   : > { %v3597_v29 = vpop.eup %3596 }
 0x15c   : > { %v3599_v30 = vpop.eup %3598  ;;  %v1010_v31 = vpack.c.bf16 %v3597_v29, %v3593_v26 }
 0x15d   : > { %v1009_v32 = vpack.c.bf16 %v3599_v30, %v3595_v28 }
 0x15e   : > { %v3199_v33 = vpop.f32.mrb[48].mxu0 }
 0x15f   : > { %3255 = vmatprep.mubr.msk.bf16.mxu1 %vm533_vm2, %v1009_v32  ;;  %3608 = vtanh.f32 %v3199_v33  ;;  %v862_v34 = vpop.f32.mrb[49].mxu0 }
 0x160   : > { %3256 = vmatmul.mubr.msk.bf16.gmra.mrb[40].mxu1 %vm533_vm2, %v1010_v31  ;;  %3610 = vtanh.f32 %v862_v34  ;;  %v3200_v35 = vpop.f32.mrb[50].mxu0 }
 0x161   : > { %v3601_v36 = vpop.eup %3600  ;;  %3612 = vtanh.f32 %v3200_v35  ;;  %v865_v37 = vpop.f32.mrb[51].mxu0 }
 0x162   : > { %v3603_v38 = vpop.eup %3602  ;;  %3614 = vtanh.f32 %v865_v37 }
 0x163   : > { %v3605_v39 = vpop.eup %3604 }
 0x164   : > { %v3607_v40 = vpop.eup %3606  ;;  %v1012_v41 = vpack.c.bf16 %v3605_v39, %v3601_v36 }
 0x165   : > { %v1011_v42 = vpack.c.bf16 %v3607_v40, %v3603_v38 }
 0x166   : > { %v3203_v43 = vpop.f32.mrb[52].mxu0 }
 0x167   : > { %3259 = vmatprep.mubr.msk.bf16.mxu1 %vm533_vm2, %v1011_v42  ;;  %3616 = vtanh.f32 %v3203_v43  ;;  %v878_v44 = vpop.f32.mrb[53].mxu0 }
 0x168   : > { %3260 = vmatmul.mubr.msk.bf16.gmra.mrb[44].mxu1 %vm533_vm2, %v1012_v41  ;;  %3618 = vtanh.f32 %v878_v44  ;;  %v3204_v45 = vpop.f32.mrb[54].mxu0 }
 0x169   : > { %v3609_v46 = vpop.eup %3608  ;;  %3620 = vtanh.f32 %v3204_v45  ;;  %v881_v47 = vpop.f32.mrb[55].mxu0 }
 0x16a   : > { %v3611_v48 = vpop.eup %3610  ;;  %3622 = vtanh.f32 %v881_v47 }
 0x16b   : > { %v3613_v49 = vpop.eup %3612 }
 0x16c   : > { %v3615_v50 = vpop.eup %3614  ;;  %v1014_v51 = vpack.c.bf16 %v3613_v49, %v3609_v46 }
 0x16d   : > { %v1013_v52 = vpack.c.bf16 %v3615_v50, %v3611_v48 }
 0x16e   : > { %v3207_v53 = vpop.f32.mrb[56].mxu0 }
 0x16f   : > { %3624 = vtanh.f32 %v3207_v53  ;;  %v894_v54 = vpop.f32.mrb[57].mxu0  ;;  %3263 = vmatprep.mubr.msk.bf16.mxu1 %vm533_vm2, %v1013_v52 }
 0x170   : > { %3626 = vtanh.f32 %v894_v54  ;;  %v3208_v55 = vpop.f32.mrb[58].mxu0  ;;  %3264 = vmatmul.mubr.msk.bf16.gmra.mrb[48].mxu1 %vm533_vm2, %v1014_v51 }
 0x171   : > { %v3617_v56 = vpop.eup %3616  ;;  %3628 = vtanh.f32 %v3208_v55  ;;  %v897_v57 = vpop.f32.mrb[59].mxu0 }
 0x172   : > { %v3619_v58 = vpop.eup %3618  ;;  %3630 = vtanh.f32 %v897_v57 }
 0x173   : > { %v3621_v59 = vpop.eup %3620 }
 0x174   : > { %v3623_v60 = vpop.eup %3622  ;;  %v1016_v61 = vpack.c.bf16 %v3621_v59, %v3617_v56 }
 0x175   : > { %v1015_v62 = vpack.c.bf16 %v3623_v60, %v3619_v58 }
 0x176   : > { %v3211_v63 = vpop.f32.mrb[60].mxu0 }
 0x177   : > { %3267 = vmatprep.mubr.msk.bf16.mxu1 %vm533_vm2, %v1015_v62  ;;  %3632 = vtanh.f32 %v3211_v63  ;;  %v910_v0 = vpop.f32.mrb[61].mxu0 }
 0x178   : > { %3268 = vmatmul.mubr.msk.bf16.gmra.mrb[52].mxu1 %vm533_vm2, %v1016_v61  ;;  %3634 = vtanh.f32 %v910_v0  ;;  %v3212_v1 = vpop.f32.mrb[62].mxu0 }
 0x179   : > { %v3625_v2 = vpop.eup %3624  ;;  %3636 = vtanh.f32 %v3212_v1  ;;  %v913_v3 = vpop.f32.mrb[63].mxu0 }
 0x17a   : > { %v3627_v4 = vpop.eup %3626  ;;  %3638 = vtanh.f32 %v913_v3 }
 0x17b   : > { %v3629_v5 = vpop.eup %3628 }
 0x17c   : > { %v3631_v6 = vpop.eup %3630  ;;  %v1018_v7 = vpack.c.bf16 %v3629_v5, %v3625_v2 }
 0x17d   : > { %v1017_v8 = vpack.c.bf16 %v3631_v6, %v3627_v4 }
 0x17f   : > { %3271 = vmatprep.mubr.msk.bf16.mxu1 %vm533_vm2, %v1017_v8 }
 0x180   : > { %3272 = vmatmul.mubr.msk.bf16.gmra.mrb[56].mxu1 %vm533_vm2, %v1018_v7 }
 0x181   : > { %v3633_v13 = vpop.eup %3632 }
 0x182   : > { %v3635_v14 = vpop.eup %3634 }
 0x183   : > { %v3637_v15 = vpop.eup %3636 }
 0x184   : > { %v3639_v16 = vpop.eup %3638  ;;  %v1020_v17 = vpack.c.bf16 %v3637_v15, %v3633_v13 }
 0x185   : > { %v1019_v18 = vpack.c.bf16 %v3639_v16, %v3635_v14 }
 0x187   : > { %3275 = vmatprep.mubr.msk.bf16.mxu1 %vm533_vm2, %v1019_v18 }
 0x188   : > { %3276 = vmatmul.mubr.msk.bf16.gmra.mrb[60].mxu1 %vm533_vm2, %v1020_v17 }
 0x1e3   : > { %v3217_v19 = vpop.f32.mrb[0].mxu1 }
 0x1e4   : > { %v1154_v20 = vpop.f32.mrb[1].mxu1 }
 0x1e5   : > { %1409 = vxpose.xlu0.b32.start [1/8] (short) (narrow) %v1154_v20, 8  ;;  %v3218_v21 = vpop.f32.mrb[2].mxu1 }
 0x1e6   : > { %v1157_v22 = vpop.f32.mrb[3].mxu1 }
 0x1e9   : > { %1410 = vxpose.xlu0.b32.cont [2/8] (short) (narrow) %v1157_v22, 8 }
 0x1eb   : > { %v3221_v23 = vpop.f32.mrb[4].mxu1 }
 0x1ec   : > { %v1170_v24 = vpop.f32.mrb[5].mxu1 }
 0x1ed   : > { %1411 = vxpose.xlu0.b32.cont [3/8] (short) (narrow) %v3217_v19, 8  ;;  %v3222_v25 = vpop.f32.mrb[6].mxu1 }
 0x1ee   : > { %v1173_v26 = vpop.f32.mrb[7].mxu1 }
 0x1f1   : > { %1412 = vxpose.xlu0.b32.cont [4/8] (short) (narrow) %v3218_v21, 8 }
 0x1f3   : > { %v3225_v27 = vpop.f32.mrb[8].mxu1 }
 0x1f4   : > { %v1186_v28 = vpop.f32.mrb[9].mxu1 }
 0x1f5   : > { %1413 = vxpose.xlu0.b32.cont [5/8] (short) (narrow) %v1170_v24, 8  ;;  %1441 = vxpose.xlu1.b32.start [1/8] (short) (narrow) %v1186_v28, 8  ;;  %v3226_v29 = vpop.f32.mrb[10].mxu1 }
 0x1f6   : > { %v1189_v30 = vpop.f32.mrb[11].mxu1 }
 0x1f9   : > { %1414 = vxpose.xlu0.b32.cont [6/8] (short) (narrow) %v1173_v26, 8  ;;  %1442 = vxpose.xlu1.b32.cont [2/8] (short) (narrow) %v1189_v30, 8 }
 0x1fb   : > { %v3229_v31 = vpop.f32.mrb[12].mxu1 }
 0x1fc   : > { %v1202_v32 = vpop.f32.mrb[13].mxu1 }
 0x1fd   : > { %1415 = vxpose.xlu0.b32.cont [7/8] (short) (narrow) %v3221_v23, 8  ;;  %1443 = vxpose.xlu1.b32.cont [3/8] (short) (narrow) %v3225_v27, 8  ;;  %v3230_v33 = vpop.f32.mrb[14].mxu1 }
 0x1fe   : > { %v1205_v34 = vpop.f32.mrb[15].mxu1 }
 0x201   : > { %1416 = vxpose.xlu0.b32.end [8/8] (short) (narrow) %v3222_v25, 8  ;;  %1444 = vxpose.xlu1.b32.cont [4/8] (short) (narrow) %v3226_v29, 8 }
 0x203   : > { %v3233_v35 = vpop.f32.mrb[16].mxu1 }
 0x204   : > { %v1218_v36 = vpop.f32.mrb[17].mxu1 }
 0x205   : > { %1445 = vxpose.xlu1.b32.cont [5/8] (short) (narrow) %v1202_v32, 8  ;;  %1473 = vxpose.xlu0.b32.start [1/8] (short) (narrow) %v1218_v36, 8  ;;  %v3234_v37 = vpop.f32.mrb[18].mxu1 }
 0x206   : > { %v1221_v38 = vpop.f32.mrb[19].mxu1 }
 0x209   : > { %1446 = vxpose.xlu1.b32.cont [6/8] (short) (narrow) %v1205_v34, 8  ;;  %1474 = vxpose.xlu0.b32.cont [2/8] (short) (narrow) %v1221_v38, 8 }
 0x20b   : > { %v3237_v39 = vpop.f32.mrb[20].mxu1 }
 0x20c   : > { %v1234_v40 = vpop.f32.mrb[21].mxu1 }
 0x20d   : > { %1447 = vxpose.xlu1.b32.cont [7/8] (short) (narrow) %v3229_v31, 8  ;;  %1475 = vxpose.xlu0.b32.cont [3/8] (short) (narrow) %v3233_v35, 8  ;;  %v3238_v41 = vpop.f32.mrb[22].mxu1 }
 0x20e   : > { %v1237_v42 = vpop.f32.mrb[23].mxu1 }
 0x211   : > { %1448 = vxpose.xlu1.b32.end [8/8] (short) (narrow) %v3230_v33, 8  ;;  %1476 = vxpose.xlu0.b32.cont [4/8] (short) (narrow) %v3234_v37, 8 }
 0x213   : > { %v3241_v43 = vpop.f32.mrb[24].mxu1 }
 0x214   : > { %v1250_v44 = vpop.f32.mrb[25].mxu1 }
 0x215   : > { %1477 = vxpose.xlu0.b32.cont [5/8] (short) (narrow) %v1234_v40, 8  ;;  %1505 = vxpose.xlu1.b32.start [1/8] (short) (narrow) %v1250_v44, 8  ;;  %v3242_v45 = vpop.f32.mrb[26].mxu1  ;;  %v3741_v40 = vmov 0.0   ;;  %v3673_v44 = vld [vmem:[%s3819_s10 + $0x8] sm:$0xff]  }
 0x216   : > { %v1253_v46 = vpop.f32.mrb[27].mxu1  ;;  %3279 = vmatprep.subr.bf16.mxu1 %v3741_v40  ;;  %3291 = vmatprep.subr.bf16.mxu0 %v3741_v40 }
 0x217   : > { %3292 = vmatpush3.bf16.msra.mxu0 %v3852_v9  ;;  %v3675_v9 = vld [vmem:[%s3819_s10 + $0x18] sm:$0xff]   ;;  %3287 = vmatprep.mubr.msk.bf16.mxu1 %vm3742_vm4, %v3741_v40 }
 0x218   : > { %3293 = vmatprep.subr.bf16.mxu0 %v3741_v40  ;;  %3299 = vmatprep.mubr.msk.bf16.mxu0 %vm3742_vm4, %v3741_v40 }
 0x219   : > { %1478 = vxpose.xlu0.b32.cont [6/8] (short) (narrow) %v1237_v42, 8  ;;  %1506 = vxpose.xlu1.b32.cont [2/8] (short) (narrow) %v1253_v46, 8  ;;  %v3674_v46 = vld [vmem:[%s3819_s10 + $0x10] sm:$0xff]  }
 0x21b   : > { %v3245_v47 = vpop.f32.mrb[28].mxu1  ;;  %3294 = vmatpush3.bf16.msra.mxu0 %v3858_v10 }
 0x21c   : > { %v1266_v48 = vpop.f32.mrb[29].mxu1  ;;  %3295 = vmatprep.subr.bf16.mxu0 %v3741_v40 }
 0x21d   : > { %1479 = vxpose.xlu0.b32.cont [7/8] (short) (narrow) %v3237_v39, 8  ;;  %1507 = vxpose.xlu1.b32.cont [3/8] (short) (narrow) %v3241_v43, 8  ;;  %v3246_v49 = vpop.f32.mrb[30].mxu1 }
 0x21e   : > { %v1269_v50 = vpop.f32.mrb[31].mxu1 }
 0x21f   : > { %3296 = vmatpush3.bf16.msra.mxu0 %v3861_v11 }
 0x220   : > { %3297 = vmatprep.subr.bf16.mxu0 %v3741_v40 }
 0x221   : > { %1480 = vxpose.xlu0.b32.end [8/8] (short) (narrow) %v3238_v41, 8  ;;  %1508 = vxpose.xlu1.b32.cont [4/8] (short) (narrow) %v3242_v45, 8  ;;  %v3672_v41 = vld [vmem:[%s3819_s10] sm:$0xff]  }
 0x222   : > { %3280 = vmatpush3.bf16.msra.mxu1 %v3672_v41 }
 0x223   : > { %v3249_v51 = vpop.f32.mrb[32].mxu1  ;;  %3281 = vmatprep.subr.bf16.mxu1 %v3741_v40  ;;  %3298 = vmatpush3.bf16.msra.mxu0 %v3868_v12 }
 0x224   : > { %v1282_v52 = vpop.f32.mrb[33].mxu1  ;;  %3315 = vmatprep.subr.bf16.mxu0 %v3741_v40 }
 0x225   : > { %1509 = vxpose.xlu1.b32.cont [5/8] (short) (narrow) %v1266_v48, 8  ;;  %1537 = vxpose.xlu0.b32.start [1/8] (short) (narrow) %v1282_v52, 8  ;;  %v3250_v53 = vpop.f32.mrb[34].mxu1 }
 0x226   : > { %v1285_v54 = vpop.f32.mrb[35].mxu1  ;;  %3282 = vmatpush3.bf16.msra.mxu1 %v3673_v44 }
 0x227   : > { %3283 = vmatprep.subr.bf16.mxu1 %v3741_v40 }
 0x229   : > { %1510 = vxpose.xlu1.b32.cont [6/8] (short) (narrow) %v1269_v50, 8  ;;  %1538 = vxpose.xlu0.b32.cont [2/8] (short) (narrow) %v1285_v54, 8 }
 0x22a   : > { %3284 = vmatpush3.bf16.msra.mxu1 %v3674_v46  ;;  %v3684_v46 = vld [vmem:[%s3819_s10 + $0x60] sm:$0xff]  }
 0x22b   : > { %v3253_v55 = vpop.f32.mrb[36].mxu1  ;;  %3285 = vmatprep.subr.bf16.mxu1 %v3741_v40 }
 0x22c   : > { %v1298_v56 = vpop.f32.mrb[37].mxu1 }
 0x22d   : > { %1511 = vxpose.xlu1.b32.cont [7/8] (short) (narrow) %v3245_v47, 8  ;;  %1539 = vxpose.xlu0.b32.cont [3/8] (short) (narrow) %v3249_v51, 8  ;;  %v3254_v57 = vpop.f32.mrb[38].mxu1 }
 0x22e   : > { %v1301_v58 = vpop.f32.mrb[39].mxu1  ;;  %3286 = vmatpush3.bf16.msra.mxu1 %v3675_v9 }
 0x22f   : > { %3303 = vmatprep.subr.bf16.mxu1 %v3741_v40 }
 0x231   : > { %1512 = vxpose.xlu1.b32.end [8/8] (short) (narrow) %v3246_v49, 8  ;;  %1540 = vxpose.xlu0.b32.cont [4/8] (short) (narrow) %v3250_v53, 8 }
 0x233   : > { %v3257_v59 = vpop.f32.mrb[40].mxu1 }
 0x234   : > { %v1314_v60 = vpop.f32.mrb[41].mxu1 }
 0x235   : > { %1541 = vxpose.xlu0.b32.cont [5/8] (short) (narrow) %v1298_v56, 8  ;;  %1569 = vxpose.xlu1.b32.start [1/8] (short) (narrow) %v1314_v60, 8  ;;  %v3258_v61 = vpop.f32.mrb[42].mxu1 }
 0x236   : > { %v1317_v62 = vpop.f32.mrb[43].mxu1 }
 0x239   : > { %1542 = vxpose.xlu0.b32.cont [6/8] (short) (narrow) %v1301_v58, 8  ;;  %1570 = vxpose.xlu1.b32.cont [2/8] (short) (narrow) %v1317_v62, 8 }
 0x23b   : > { %v3261_v63 = vpop.f32.mrb[44].mxu1 }
 0x23c   : > { %v1330_v0 = vpop.f32.mrb[45].mxu1 }
 0x23d   : > { %1543 = vxpose.xlu0.b32.cont [7/8] (short) (narrow) %v3253_v55, 8  ;;  %1571 = vxpose.xlu1.b32.cont [3/8] (short) (narrow) %v3257_v59, 8  ;;  %v3262_v1 = vpop.f32.mrb[46].mxu1 }
 0x23e   : > { %v1333_v2 = vpop.f32.mrb[47].mxu1 }
 0x241   : > { %1544 = vxpose.xlu0.b32.end [8/8] (short) (narrow) %v3254_v57, 8  ;;  %1572 = vxpose.xlu1.b32.cont [4/8] (short) (narrow) %v3258_v61, 8 }
 0x243   : > { %v3265_v3 = vpop.f32.mrb[48].mxu1 }
 0x244   : > { %v1346_v4 = vpop.f32.mrb[49].mxu1 }
 0x245   : > { %1573 = vxpose.xlu1.b32.cont [5/8] (short) (narrow) %v1330_v0, 8  ;;  %v3266_v5 = vpop.f32.mrb[50].mxu1 }
 0x246   : > { %v1349_v6 = vpop.f32.mrb[51].mxu1 }
 0x249   : > { %1574 = vxpose.xlu1.b32.cont [6/8] (short) (narrow) %v1333_v2, 8 }
 0x24b   : > { %v3269_v7 = vpop.f32.mrb[52].mxu1 }
 0x24c   : > { %v1362_v8 = vpop.f32.mrb[53].mxu1 }
 0x24d   : > { %1575 = vxpose.xlu1.b32.cont [7/8] (short) (narrow) %v3261_v63, 8  ;;  %v3270_v13 = vpop.f32.mrb[54].mxu1 }
 0x24e   : > { %v1365_v14 = vpop.f32.mrb[55].mxu1 }
 0x251   : > { %1576 = vxpose.xlu1.b32.end [8/8] (short) (narrow) %v3262_v1, 8 }
 0x253   : > { %v3273_v15 = vpop.f32.mrb[56].mxu1 }
 0x254   : > { %v1378_v16 = vpop.f32.mrb[57].mxu1 }
 0x255   : > { %v3274_v17 = vpop.f32.mrb[58].mxu1 }
 0x256   : > { %v1381_v18 = vpop.f32.mrb[59].mxu1 }
 0x25b   : > { %v3277_v19 = vpop.f32.mrb[60].mxu1 }
 0x25c   : > { %v1394_v20 = vpop.f32.mrb[61].mxu1 }
 0x25d   : > { %v3278_v21 = vpop.f32.mrb[62].mxu1 }
 0x25e   : > { %v1397_v22 = vpop.f32.mrb[63].mxu1 }
 0x265   : > { %v1425_v23 = vpop.trf.xlu0 }
 0x266   : > { %v1666_v24 = vsel %vm1665_vm3, %v1425_v23, -inf }
 0x26e   : > { %1667 = vmax.xlane.f32.xlu0 %v1666_v24 }
 0x275   : > { %v3958_v25 = vpop.trf.xlu1 }
 0x276   : > { %v1669_v26 = vsel %vm1665_vm3, %v3958_v25, -inf }
 0x278   : > { %1670 = vmax.xlane.f32.xlu1 %v1669_v26  ;;  %v3680_v26 = vld [vmem:[%s3819_s10 + $0x80] sm:$0xff]  }
 0x285   : > { %v1489_v27 = vpop.trf.xlu0 }
 0x286   : > { %v1672_v28 = vsel %vm1665_vm3, %v1489_v27, -inf }
 0x287   : > { %1673 = vmax.xlane.f32.xlu0 %v1672_v28 }
 0x295   : > { %v3963_v29 = vpop.trf.xlu1 }
 0x296   : > { %v1675_v30 = vsel %vm1665_vm3, %v3963_v29, -inf }
 0x2a5   : > { %v3971_v33 = vpop.trf.xlu0 }
 0x2a6   : > { %v1678_v34 = vsel %vm1665_vm3, %v3971_v33, -inf }
 0x2ab   : > { %1601 = vxpose.xlu1.b32.start [1/8] (short) (narrow) %v1346_v4, 8 }
 0x2af   : > { %1602 = vxpose.xlu1.b32.cont [2/8] (short) (narrow) %v1349_v6, 8 }
 0x2b3   : > { %1603 = vxpose.xlu1.b32.cont [3/8] (short) (narrow) %v3265_v3, 8 }
 0x2b4   : > { %1633 = vxpose.xlu0.b32.start [1/8] (short) (narrow) %v1378_v16, 8 }
 0x2b5   : > { %v3967_v31 = vpop.trf.xlu1 }
 0x2b6   : > { %v1681_v32 = vsel %vm1665_vm3, %v3967_v31, -inf }
 0x2b7   : > { %1604 = vxpose.xlu1.b32.cont [4/8] (short) (narrow) %v3266_v5, 8 }
 0x2b8   : > { %1634 = vxpose.xlu0.b32.cont [2/8] (short) (narrow) %v1381_v18, 8  ;;  %v3679_v18 = vld [vmem:[%s3819_s10 + $0x58] sm:$0xff]  }
 0x2bb   : > { %1605 = vxpose.xlu1.b32.cont [5/8] (short) (narrow) %v1362_v8, 8 }
 0x2bc   : > { %1635 = vxpose.xlu0.b32.cont [3/8] (short) (narrow) %v3273_v15, 8  ;;  %v3677_v15 = vld [vmem:[%s3819_s10 + $0x48] sm:$0xff]  }
 0x2bf   : > { %1606 = vxpose.xlu1.b32.cont [6/8] (short) (narrow) %v1365_v14, 8  ;;  %v3676_v14 = vld [vmem:[%s3819_s10 + $0x40] sm:$0xff]  }
 0x2c0   : > { %1636 = vxpose.xlu0.b32.cont [4/8] (short) (narrow) %v3274_v17, 8  ;;  %v3678_v17 = vld [vmem:[%s3819_s10 + $0x50] sm:$0xff]  }
 0x2c3   : > { %1607 = vxpose.xlu1.b32.cont [7/8] (short) (narrow) %v3269_v7, 8 }
 0x2c4   : > { %1637 = vxpose.xlu0.b32.cont [5/8] (short) (narrow) %v1394_v20, 8 }
 0x2c7   : > { %1608 = vxpose.xlu1.b32.end [8/8] (short) (narrow) %v3270_v13, 8 }
 0x2c8   : > { %1638 = vxpose.xlu0.b32.cont [6/8] (short) (narrow) %v1397_v22, 8 }
 0x2cc   : > { %1639 = vxpose.xlu0.b32.cont [7/8] (short) (narrow) %v3277_v19, 8 }
 0x2d0   : > { %1640 = vxpose.xlu0.b32.end [8/8] (short) (narrow) %v3278_v21, 8 }
 0x2ee   : > { %1676 = vmax.xlane.f32.xlu1 %v1675_v30  ;;  %v3681_v30 = vld [vmem:[%s3819_s10 + $0x88] sm:$0xff]  }
 0x2f2   : > { %1682 = vmax.xlane.f32.xlu1 %v1681_v32 }
 0x2fb   : > { %v1668_v35 = vpop.xlane.xlu0 %1667 }
 0x2fc   : > { %v1690_v36 = vsub.f32 %v1425_v23, %v1668_v35 }
 0x2fd   : > { %1679 = vmax.xlane.f32.xlu0 %v1678_v34  ;;  %v3683_v34 = vld [vmem:[%s3819_s10 + $0x98] sm:$0xff]  }
 0x2fe   : > { %v1698_v37 = vmul.f32 1.442695, %v1690_v36 }
 0x300   : > { %3640 = vpow2.f32 %v1698_v37 }
 0x305   : > { %v1671_v10 = vpop.xlane.xlu1 %1670 }
 0x306   : > { %v1691_v48 = vsub.f32 %v3958_v25, %v1671_v10 }
 0x308   : > { %v1700_v49 = vmul.f32 1.442695, %v1691_v48  ;;  %v3685_v48 = vld [vmem:[%s3819_s10 + $0x68] sm:$0xff]  }
 0x30a   : > { %v3975_v38 = vpop.eup %3640 }
 0x30b   : > { %v1714_v39 = vsel %vm1665_vm3, %v3975_v38, 0.0 }
 0x30c   : > { %1715 = vadd.xlane.f32.xlu0 %v1714_v39 }
 0x314   : > { %v1674_v42 = vpop.xlane.xlu0 %1673 }
 0x315   : > { %v1692_v43 = vsub.f32 %v1489_v27, %v1674_v42 }
 0x317   : > { %v1702_v45 = vmul.f32 1.442695, %v1692_v43 }
 0x319   : > { %3642 = vpow2.f32 %v1702_v45 }
 0x31a   : > { %3644 = vpow2.f32 %v1700_v49  ;;  %v3687_v49 = vld [vmem:[%s3819_s10 + $0x78] sm:$0xff]  }
 0x323   : > { %v3997_v47 = vpop.eup %3642 }
 0x324   : > { %v1720_v11 = vsel %vm1665_vm3, %v3997_v47, 0.0  ;;  %v4008_v53 = vpop.eup %3644 }
 0x325   : > { %1721 = vadd.xlane.f32.xlu0 %v1720_v11  ;;  %v1717_v54 = vsel %vm1665_vm3, %v4008_v53, 0.0  ;;  %v3686_v11 = vld [vmem:[%s3819_s10 + $0x70] sm:$0xff]  }
 0x32b   : > { %v1617_v12 = vpop.trf.xlu1 }
 0x32c   : > { %v1684_v50 = vsel %vm1665_vm3, %v1617_v12, -inf }
 0x32d   : > { %1685 = vmax.xlane.f32.xlu1 %v1684_v50 }
 0x334   : > { %v1649_v51 = vpop.trf.xlu0 }
 0x335   : > { %v1687_v52 = vsel %vm1665_vm3, %v1649_v51, -inf }
 0x336   : > { %1688 = vmax.xlane.f32.xlu1 %v1687_v52 }
 0x33a   : > { %1718 = vadd.xlane.f32.xlu1 %v1717_v54 }
 0x37b   : > { %v1677_v55 = vpop.xlane.xlu1 %1676 }
 0x37c   : > { %v1693_v56 = vsub.f32 %v3963_v29, %v1677_v55 }
 0x37e   : > { %v1704_v57 = vmul.f32 1.442695, %v1693_v56 }
 0x37f   : > { %v1683_v58 = vpop.xlane.xlu1 %1682 }
 0x380   : > { %3646 = vpow2.f32 %v1704_v57  ;;  %v1695_v59 = vsub.f32 %v3967_v31, %v1683_v58  ;;  %v3688_v57 = vld [vmem:[%s3819_s10 + $0xa0] sm:$0xff]  }
 0x382   : > { %v1708_v60 = vmul.f32 1.442695, %v1695_v59  ;;  %v3689_v59 = vld [vmem:[%s3819_s10 + $0xa8] sm:$0xff]  }
 0x384   : > { %3648 = vpow2.f32 %v1708_v60 }
 0x38a   : > { %v4014_v61 = vpop.eup %3646  ;;  %v1680_v62 = vpop.xlane.xlu0 %1679 }
 0x38b   : > { %v1694_v63 = vsub.f32 %v3971_v33, %v1680_v62  ;;  %v1723_v0 = vsel %vm1665_vm3, %v4014_v61, 0.0  ;;  %v3682_v33 = vld [vmem:[%s3819_s10 + $0x90] sm:$0xff]  }
 0x38c   : > { %1724 = vadd.xlane.f32.xlu1 %v1723_v0 }
 0x38d   : > { %v1706_v1 = vmul.f32 1.442695, %v1694_v63 }
 0x38e   : > { %v4019_v2 = vpop.eup %3648 }
 0x38f   : > { %3650 = vpow2.f32 %v1706_v1  ;;  %v1729_v3 = vsel %vm1665_vm3, %v4019_v2, 0.0  ;;  %v3691_v1 = vld [vmem:[%s3819_s10 + $0xb8] sm:$0xff]  }
 0x390   : > { %1730 = vadd.xlane.f32.xlu1 %v1729_v3 }
 0x399   : > { %v4023_v4 = vpop.eup %3650  ;;  %v1716_v5 = vpop.xlane.xlu0 %1715 }
 0x39a   : > { %3652 = vrcp.f32 %v1716_v5  ;;  %v1726_v6 = vsel %vm1665_vm3, %v4023_v4, 0.0 }
 0x39b   : > { %1727 = vadd.xlane.f32.xlu0 %v1726_v6  ;;  %v3694_v6 = vld [vmem:[%s3819_s10 + $0xc8] sm:$0xff]  }
 0x3a4   : > { %v3653_v7 = vpop.eup %3652 }
 0x3a5   : > { %v1746_v8 = vmul.f32 %v3653_v7, %v3975_v38  ;;  %v3695_v7 = vld [vmem:[%s3819_s10 + $0xe8] sm:$0xff]  }
 0x3a7   : > { %v4028_v13 = vpack.c.bf16 %v1746_v8, %v1746_v8  ;;  %v2717_v38 = vmul.f32 %v1746_v8, %v1746_v8  ;;  %v3696_v8 = vld [vmem:[%s3819_s10 + $0xd0] sm:$0xff]  }
 0x3a9   : > { %3288 = vmatmul.mubr.msk.bf16.vlgmr.msra.gmra.mrb[64].mxu1 %vm1665_vm3, %v4028_v13  ;;  %v2725_v44 = vsel %vm1665_vm3, %v2717_v38, 0.0 }
 0x3aa   : > { %3304 = vmatpush3.bf16.msra.mxu1 %v3676_v14  ;;  %3311 = vmatprep.mubr.msk.bf16.mxu1 %vm3742_vm4, %v3741_v40  ;;  %v3697_v14 = vld [vmem:[%s3819_s10 + $0xf0] sm:$0xff]  }
 0x3ab   : > { %3305 = vmatprep.subr.bf16.mxu1 %v3741_v40 }
 0x3ae   : > { %3306 = vmatpush3.bf16.msra.mxu1 %v3677_v15  ;;  %v3698_v15 = vld [vmem:[%s3819_s10 + $0xd8] sm:$0xff]  }
 0x3af   : > { %3307 = vmatprep.subr.bf16.mxu1 %v3741_v40 }
 0x3b2   : > { %v1722_v16 = vpop.xlane.xlu0 %1721  ;;  %3308 = vmatpush3.bf16.msra.mxu1 %v3678_v17 }
 0x3b3   : > { %3654 = vrcp.f32 %v1722_v16  ;;  %3309 = vmatprep.subr.bf16.mxu1 %v3741_v40  ;;  %v3699_v16 = vld [vmem:[%s3819_s10 + $0xf8] sm:$0xff]  }
 0x3b6   : > { %3310 = vmatpush3.bf16.msra.mxu1 %v3679_v18 }
 0x3b7   : > { %3327 = vmatprep.subr.bf16.mxu1 %v3741_v40 }
 0x3ba   : > { %v1686_v19 = vpop.xlane.xlu1 %1685 }
 0x3bb   : > { %v1696_v20 = vsub.f32 %v1617_v12, %v1686_v19 }
 0x3bd   : > { %v3655_v21 = vpop.eup %3654  ;;  %v1710_v22 = vmul.f32 1.442695, %v1696_v20 }
 0x3be   : > { %v1748_v23 = vmul.f32 %v3655_v21, %v3997_v47 }
 0x3bf   : > { %3656 = vpow2.f32 %v1710_v22 }
 0x3c0   : > { %v4043_v24 = vpack.c.bf16 %v1748_v23, %v1748_v23  ;;  %v2719_v41 = vmul.f32 %v1748_v23, %v1748_v23 }
 0x3c2   : > { %3312 = vmatmul.mubr.msk.bf16.vlgmr.msra.gmra.mrb[68].mxu1 %vm1665_vm3, %v4043_v24  ;;  %v2728_v10 = vsel %vm1665_vm3, %v2719_v41, 0.0 }
 0x3c3   : > { %v1689_v25 = vpop.xlane.xlu1 %1688  ;;  %3328 = vmatpush3.bf16.msra.mxu1 %v3680_v26  ;;  %3335 = vmatprep.mubr.msk.bf16.mxu1 %vm3742_vm4, %v3741_v40 }
 0x3c4   : > { %v1697_v27 = vsub.f32 %v1649_v51, %v1689_v25  ;;  %3329 = vmatprep.subr.bf16.mxu1 %v3741_v40  ;;  %v1767_v25 = vsel %vm1665_vm3, %v4028_v13, 0 }
 0x3c6   : > { %v1712_v28 = vmul.f32 1.442695, %v1697_v27 }
 0x3c7   : > { %v1719_v29 = vpop.xlane.xlu1 %1718  ;;  %3330 = vmatpush3.bf16.msra.mxu1 %v3681_v30 }
 0x3c8   : > { %3658 = vpow2.f32 %v1712_v28  ;;  %3331 = vmatprep.subr.bf16.mxu1 %v3741_v40 }
 0x3c9   : > { %v4053_v31 = vpop.eup %3656  ;;  %3660 = vrcp.f32 %v1719_v29 }
 0x3ca   : > { %v1732_v32 = vsel %vm1665_vm3, %v4053_v31, 0.0 }
 0x3cb   : > { %1733 = vadd.xlane.f32.xlu0 %v1732_v32  ;;  %3332 = vmatpush3.bf16.msra.mxu1 %v3682_v33 }
 0x3cc   : > { %3333 = vmatprep.subr.bf16.mxu1 %v3741_v40 }
 0x3cf   : > { %3334 = vmatpush3.bf16.msra.mxu1 %v3683_v34 }
 0x3d0   : > { %3351 = vmatprep.subr.bf16.mxu1 %v3741_v40 }
 0x3d2   : > { %v4061_v35 = vpop.eup %3658 }
 0x3d3   : > { %v3661_v36 = vpop.eup %3660  ;;  %v1735_v37 = vsel %vm1665_vm3, %v4061_v35, 0.0 }
 0x3d4   : > { %v1747_v39 = vmul.f32 %v3661_v36, %v4008_v53  ;;  %1736 = vadd.xlane.f32.xlu1 %v1735_v37  ;;  %v1861_v37 = vsel %vm1665_vm3, %v4043_v24, 0 }
 0x3d6   : > { %v4066_v42 = vpack.c.bf16 %v1747_v39, %v1747_v39  ;;  %v2718_v43 = vmul.f32 %v1747_v39, %v1747_v39 }
 0x3d8   : > { %3300 = vmatmul.mubr.msk.bf16.vlgmr.msra.gmra.mrb[64].mxu0 %vm1665_vm3, %v4066_v42  ;;  %v2726_v45 = vsel %vm1665_vm3, %v2718_v43, 0.0 }
 0x3d9   : > { %3316 = vmatpush3.bf16.msra.mxu0 %v3684_v46  ;;  %3323 = vmatprep.mubr.msk.bf16.mxu0 %vm3742_vm4, %v3741_v40  ;;  %v2727_v9 = vadd.f32 %v2726_v45, %v2725_v44 }
 0x3da   : > { %3317 = vmatprep.subr.bf16.mxu0 %v3741_v40 }
 0x3db   : > { %v2729_v47 = vadd.f32 %v2728_v10, %v2727_v9 }
 0x3dd   : > { %3318 = vmatpush3.bf16.msra.mxu0 %v3685_v48 }
 0x3de   : > { %3319 = vmatprep.subr.bf16.mxu0 %v3741_v40 }
 0x3e1   : > { %3320 = vmatpush3.bf16.msra.mxu0 %v3686_v11 }
 0x3e2   : > { %3321 = vmatprep.subr.bf16.mxu0 %v3741_v40 }
 0x3e5   : > { %3322 = vmatpush3.bf16.msra.mxu0 %v3687_v49 }
 0x3e6   : > { %3339 = vmatprep.subr.bf16.mxu0 %v3741_v40 }
 0x419   : > { %v1725_v12 = vpop.xlane.xlu1 %1724 }
 0x41a   : > { %3662 = vrcp.f32 %v1725_v12 }
 0x41d   : > { %v1731_v50 = vpop.xlane.xlu1 %1730 }
 0x41e   : > { %3664 = vrcp.f32 %v1731_v50 }
 0x424   : > { %v3663_v51 = vpop.eup %3662 }
 0x425   : > { %v1749_v52 = vmul.f32 %v3663_v51, %v4014_v61  ;;  %v3690_v61 = vld [vmem:[%s3819_s10 + $0xb0] sm:$0xff]  }
 0x427   : > { %v4084_v53 = vpack.c.bf16 %v1749_v52, %v1749_v52  ;;  %v2720_v54 = vmul.f32 %v1749_v52, %v1749_v52 }
 0x428   : > { %v1728_v55 = vpop.xlane.xlu0 %1727  ;;  %v3665_v60 = vpop.eup %3664 }
 0x429   : > { %3666 = vrcp.f32 %v1728_v55  ;;  %3324 = vmatmul.mubr.msk.bf16.vlgmr.msra.gmra.mrb[68].mxu0 %vm1665_vm3, %v4084_v53  ;;  %v2730_v56 = vsel %vm1665_vm3, %v2720_v54, 0.0  ;;  %v1751_v63 = vmul.f32 %v3665_v60, %v4019_v2  ;;  %v3692_v2 = vld [vmem:[%s3819_s10 + $0xc0] sm:$0xff]   ;;  %v1908_v43 = vsel %vm1665_vm3, %v4084_v53, 0 }
 0x42a   : > { %3340 = vmatpush3.bf16.msra.mxu0 %v3688_v57  ;;  %3347 = vmatprep.mubr.msk.bf16.mxu0 %vm3742_vm4, %v3741_v40  ;;  %v2731_v58 = vadd.f32 %v2730_v56, %v2729_v47 }
 0x42b   : > { %3341 = vmatprep.subr.bf16.mxu0 %v3741_v40  ;;  %v4102_v5 = vpack.c.bf16 %v1751_v63, %v1751_v63  ;;  %v2722_v26 = vmul.f32 %v1751_v63, %v1751_v63 }
 0x42d   : > { %v2002_v9 = vsel %vm1665_vm3, %v4102_v5, 0 }
 0x42e   : > { %3342 = vmatpush3.bf16.msra.mxu0 %v3689_v59 }
 0x42f   : > { %3343 = vmatprep.subr.bf16.mxu0 %v3741_v40 }
 0x432   : > { %3344 = vmatpush3.bf16.msra.mxu0 %v3690_v61 }
 0x433   : > { %v3667_v62 = vpop.eup %3666  ;;  %3345 = vmatprep.subr.bf16.mxu0 %v3741_v40 }
 0x434   : > { %v1750_v0 = vmul.f32 %v3667_v62, %v4023_v4  ;;  %v3693_v4 = vld [vmem:[%s3819_s10 + $0xe0] sm:$0xff]  }
 0x436   : > { %3346 = vmatpush3.bf16.msra.mxu0 %v3691_v1  ;;  %v4100_v3 = vpack.c.bf16 %v1750_v0, %v1750_v0  ;;  %v2721_v20 = vmul.f32 %v1750_v0, %v1750_v0 }
 0x437   : > { %3363 = vmatprep.subr.bf16.mxu0 %v3741_v40 }
 0x438   : > { %3336 = vmatmul.mubr.msk.bf16.vlgmr.msra.gmra.mrb[72].mxu1 %vm1665_vm3, %v4100_v3  ;;  %v2732_v23 = vsel %vm1665_vm3, %v2721_v20, 0.0 }
 0x439   : > { %3348 = vmatmul.mubr.msk.bf16.vlgmr.msra.gmra.mrb[72].mxu0 %vm1665_vm3, %v4102_v5  ;;  %3352 = vmatpush3.bf16.msra.mxu1 %v3692_v2  ;;  %v2733_v28 = vadd.f32 %v2732_v23, %v2731_v58 }
 0x43a   : > { %3353 = vmatprep.subr.bf16.mxu1 %v3741_v40  ;;  %3364 = vmatpush3.bf16.msra.mxu0 %v3693_v4  ;;  %v2143_v4 = vlaneseq }
 0x43b   : > { %3365 = vmatprep.subr.bf16.mxu0 %v3741_v40  ;;  %3359 = vmatprep.mubr.msk.bf16.mxu1 %vm3742_vm4, %v3741_v40 }
 0x43c   : > { %3371 = vmatprep.mubr.msk.bf16.mxu0 %vm3742_vm4, %v3741_v40 }
 0x43d   : > { %3354 = vmatpush3.bf16.msra.mxu1 %v3694_v6 }
 0x43e   : > { %3355 = vmatprep.subr.bf16.mxu1 %v3741_v40  ;;  %3366 = vmatpush3.bf16.msra.mxu0 %v3695_v7  ;;  %v2144_v7 = vshrl.u32 %v2143_v4, 7 }
 0x43f   : > { %3367 = vmatprep.subr.bf16.mxu0 %v3741_v40 }
 0x441   : > { %3356 = vmatpush3.bf16.msra.mxu1 %v3696_v8 }
 0x442   : > { %3357 = vmatprep.subr.bf16.mxu1 %v3741_v40  ;;  %3368 = vmatpush3.bf16.msra.mxu0 %v3697_v14 }
 0x443   : > { %3369 = vmatprep.subr.bf16.mxu0 %v3741_v40 }
 0x445   : > { %3358 = vmatpush3.bf16.msra.mxu1 %v3698_v15 }
 0x446   : > { %3375 = vmatprep.subr.bf16.mxu1 %v3741_v40  ;;  %3370 = vmatpush3.bf16.msra.mxu0 %v3699_v16 }
 0x447   : > { %3381 = vmatprep.subr.bf16.mxu0 %v3741_v40 }
 0x458   : > { %v1734_v17 = vpop.xlane.xlu0 %1733 }
 0x459   : > { %3668 = vrcp.f32 %v1734_v17 }
 0x461   : > { %v1737_v18 = vpop.xlane.xlu1 %1736 }
 0x462   : > { %3670 = vrcp.f32 %v1737_v18 }
 0x463   : > { %v3669_v19 = vpop.eup %3668 }
 0x464   : > { %v1752_v21 = vmul.f32 %v3669_v19, %v4053_v31  ;;  %v2734_v31 = vsel %vm1665_vm3, %v2722_v26, 0.0 }
 0x465   : > { %v2735_v33 = vadd.f32 %v2734_v31, %v2733_v28 }
 0x466   : > { %v1760_v22 = vpack.c.bf16 %v1752_v21, %v1752_v21  ;;  %v2723_v27 = vmul.f32 %v1752_v21, %v1752_v21 }
 0x468   : > { %3360 = vmatmul.mubr.msk.bf16.vlgmr.msra.gmra.mrb[76].mxu1 %vm1665_vm3, %v1760_v22  ;;  %v2736_v32 = vsel %vm1665_vm3, %v2723_v27, 0.0 }
 0x469   : > { %3376 = vmatpush3.bf16.xpose.msra.mxu1 %v1767_v25  ;;  %3377 = vmatprep.mubr.msk.bf16.mxu1 %vm3742_vm4, %v3741_v40  ;;  %v2737_v38 = vadd.f32 %v2736_v32, %v2735_v33 }
 0x46a   : > { %3387 = vmatprep.subr.bf16.mxu1 %v3741_v40 }
 0x46c   : > { %v3671_v29 = vpop.eup %3670 }
 0x46d   : > { %v1753_v30 = vmul.f32 %v3671_v29, %v4061_v35  ;;  %v1814_v35 = vsel %vm1665_vm3, %v4066_v42, 0 }
 0x46f   : > { %v1761_v34 = vpack.c.bf16 %v1753_v30, %v1753_v30  ;;  %v2724_v36 = vmul.f32 %v1753_v30, %v1753_v30 }
 0x470   : > { %3378 = vmatmul.mubr.msk.bf16.vlgmr.msra.gmra.mrb[80].mxu1 %vm1665_vm3, %v4028_v13  ;;  %v1955_v13 = vsel %vm1665_vm3, %v4100_v3, 0 }
 0x471   : > { %3388 = vmatpush3.bf16.xpose.msra.mxu1 %v1861_v37  ;;  %3372 = vmatmul.mubr.msk.bf16.vlgmr.msra.gmra.mrb[76].mxu0 %vm1665_vm3, %v1761_v34  ;;  %v2738_v39 = vsel %vm1665_vm3, %v2724_v36, 0.0  ;;  %v2096_v10 = vsel %vm1665_vm3, %v1761_v34, 0 }
 0x472   : > { %3382 = vmatpush3.bf16.xpose.msra.mxu0 %v1814_v35  ;;  %v2739_v41 = vadd.f32 %v2738_v39, %v2737_v38  ;;  %3389 = vmatprep.mubr.msk.bf16.mxu1 %vm3742_vm4, %v3741_v40 }
 0x473   : > { %3399 = vmatprep.subr.bf16.mxu1 %v3741_v40  ;;  %3383 = vmatprep.mubr.msk.bf16.mxu0 %vm3742_vm4, %v3741_v40 }
 0x474   : > { %2740 = vadd.xlane.f32.xlu1 %v2739_v41  ;;  %3393 = vmatprep.subr.bf16.mxu0 %v3741_v40 }
 0x478   : > { %3390 = vmatmul.mubr.msk.bf16.vlgmr.msra.gmra.mrb[84].mxu1 %vm1665_vm3, %v4043_v24 }
 0x479   : > { %3400 = vmatpush3.bf16.xpose.msra.mxu1 %v1955_v13  ;;  %3384 = vmatmul.mubr.msk.bf16.vlgmr.msra.gmra.mrb[80].mxu0 %vm1665_vm3, %v4066_v42  ;;  %v2049_v42 = vsel %vm1665_vm3, %v1760_v22, 0 }
 0x47a   : > { %3394 = vmatpush3.bf16.xpose.msra.mxu0 %v1908_v43  ;;  %3401 = vmatprep.mubr.msk.bf16.mxu1 %vm3742_vm4, %v3741_v40 }
 0x47b   : > { %3411 = vmatprep.subr.bf16.mxu1 %v3741_v40  ;;  %3395 = vmatprep.mubr.msk.bf16.mxu0 %vm3742_vm4, %v3741_v40 }
 0x47c   : > { %v1803_v24 = vpop.f32.mrb[64].mxu1  ;;  %3405 = vmatprep.subr.bf16.mxu0 %v3741_v40 }
 0x47d   : > { %v3289_v44 = vpop.f32.mrb[65].mxu1  ;;  %v2333_v51 = vmul.f32 %v1803_v24, %v1803_v24 }
 0x47e   : > { %v1806_v45 = vpop.f32.mrb[66].mxu1 }
 0x47f   : > { %v3290_v46 = vpop.f32.mrb[67].mxu1 }
 0x480   : > { %3402 = vmatmul.mubr.msk.bf16.vlgmr.msra.gmra.mrb[88].mxu1 %vm1665_vm3, %v4100_v3 }
 0x481   : > { %3412 = vmatpush3.bf16.xpose.msra.mxu1 %v2049_v42  ;;  %3396 = vmatmul.mubr.msk.bf16.vlgmr.msra.gmra.mrb[84].mxu0 %vm1665_vm3, %v4084_v53  ;;  %v2308_v53 = vsel %vm533_vm2, %v1803_v24, 0.0 }
 0x482   : > { %3406 = vmatpush3.bf16.xpose.msra.mxu0 %v2002_v9  ;;  %3413 = vmatprep.mubr.msk.bf16.mxu1 %vm3742_vm4, %v3741_v40 }
 0x483   : > { %3407 = vmatprep.mubr.msk.bf16.mxu0 %vm3742_vm4, %v3741_v40  ;;  %3417 = vmatprep.subr.bf16.mxu0 %v3741_v40 }
 0x488   : > { %3414 = vmatmul.mubr.msk.bf16.vlgmr.msra.gmra.mrb[92].mxu1 %vm1665_vm3, %v1760_v22 }
 0x489   : > { %3408 = vmatmul.mubr.msk.bf16.vlgmr.msra.gmra.mrb[88].mxu0 %vm1665_vm3, %v4102_v5  ;;  %v3743_v5 = vmov 1983009808  }
 0x48a   : > { %3418 = vmatpush3.bf16.xpose.msra.mxu0 %v2096_v10  ;;  %3419 = vmatprep.mubr.msk.bf16.mxu0 %vm3742_vm4, %v3741_v40  ;;  %v2341_v40 = vsel %vm533_vm2, %v2333_v51, 0.0  ;;  %v2141_v2 = vunpack.c.l.s4 %v3743_v5 }
 0x48c   : > { %v2142_v6 = vunpack.c.0.s8 %v2141_v2 }
 0x48e   : > { %v4193_v8 = vsub.s32 %v2142_v6, %v2144_v7 }
 0x491   : > { %3420 = vmatmul.mubr.msk.bf16.vlgmr.msra.gmra.mrb[92].mxu0 %vm1665_vm3, %v1761_v34 }
 0x495   : > { %v1897_v47 = vpop.f32.mrb[68].mxu1 }
 0x496   : > { %v2138_v48 = vcombine.low %v1803_v24, %v1897_v47  ;;  %v2139_v11 = vcombine.high %v1803_v24, %v1897_v47  ;;  %v3313_v49 = vpop.f32.mrb[69].mxu1  ;;  %v2335_v54 = vmul.f32 %v1897_v47, %v1897_v47  ;;  %v2311_v60 = vsel %vm533_vm2, %v1897_v47, 0.0 }
 0x497   : > { %v1900_v12 = vpop.f32.mrb[70].mxu1  ;;  %v3744_v49 = vmov 1934713408  }
 0x498   : > { %v3314_v50 = vpop.f32.mrb[71].mxu1  ;;  %v2344_v1 = vsel %vm533_vm2, %v2335_v54, 0.0  ;;  %v4197_v20 = vrot.slane %v2138_v48, %v4193_v8  ;;  %v4200_v23 = vrot.slane %v2139_v11, %v4193_v8  ;;  %v2205_v12 = vunpack.c.l.s4 %v3744_v49 }
 0x4ab   : > { %v1850_v52 = vpop.f32.mrb[64].mxu0 }
 0x4ac   : > { %v2309_v55 = vsel %vm533_vm2, %v1850_v52, 0.0  ;;  %v2334_v56 = vmul.f32 %v1850_v52, %v1850_v52  ;;  %v3301_v57 = vpop.f32.mrb[65].mxu0 }
 0x4ad   : > { %v2310_v58 = vadd.f32 %v2309_v55, %v2308_v53  ;;  %v1853_v59 = vpop.f32.mrb[66].mxu0 }
 0x4ae   : > { %v2342_v61 = vsel %vm533_vm2, %v2334_v56, 0.0  ;;  %v3302_v62 = vpop.f32.mrb[67].mxu0 }
 0x4af   : > { %v2343_v63 = vadd.f32 %v2342_v61, %v2341_v40  ;;  %v2312_v0 = vadd.f32 %v2311_v60, %v2310_v58  ;;  %v2206_v40 = vunpack.c.0.s8 %v2205_v12 }
 0x4b1   : > { %v2345_v3 = vadd.f32 %v2344_v1, %v2343_v63  ;;  %v2209_v63 = vsub.s32 %v2206_v40, %v2144_v7  ;;  %v2307_v40 = vld [vmem:[%s3829_s17] sm:$0x1] }
 0x4fc   : > { %v1944_v14 = vpop.f32.mrb[68].mxu0 }
 0x4fd   : > { %v2154_v15 = vcombine.low %v1850_v52, %v1944_v14  ;;  %v2155_v16 = vcombine.high %v1850_v52, %v1944_v14  ;;  %v2313_v17 = vsel %vm533_vm2, %v1944_v14, 0.0  ;;  %v2336_v18 = vmul.f32 %v1944_v14, %v1944_v14  ;;  %v3325_v19 = vpop.f32.mrb[69].mxu0 }
 0x4fe   : > { %v2314_v21 = vadd.f32 %v2313_v17, %v2312_v0  ;;  %v1947_v22 = vpop.f32.mrb[70].mxu0 }
 0x4ff   : > { %v4203_v25 = vrot.slane %v2154_v15, %v4193_v8  ;;  %v4206_v26 = vrot.slane %v2155_v16, %v4193_v8  ;;  %v2346_v27 = vsel %vm533_vm2, %v2336_v18, 0.0  ;;  %v3326_v28 = vpop.f32.mrb[71].mxu0 }
 0x500   : > { %v2347_v29 = vadd.f32 %v2346_v27, %v2345_v3 }
 0x501   : > { %v2218_v30 = vcombine.low %v4200_v23, %v4206_v26  ;;  %v2203_v31 = vcombine.high %v4197_v20, %v4203_v25  ;;  %v2202_v32 = vcombine.low %v4197_v20, %v4203_v25  ;;  %v2219_v33 = vcombine.high %v4200_v23, %v4206_v26 }
 0x503   : > { %v4229_v28 = vrot.slane %v2218_v30, %v2209_v63 }
 0x50b   : > { %v1991_v34 = vpop.f32.mrb[72].mxu1 }
 0x50c   : > { %v2315_v36 = vsel %vm533_vm2, %v1991_v34, 0.0  ;;  %v2337_v37 = vmul.f32 %v1991_v34, %v1991_v34  ;;  %v2038_v38 = vpop.f32.mrb[72].mxu0  ;;  %v3337_v35 = vpop.f32.mrb[73].mxu1 }
 0x50d   : > { %v2316_v39 = vadd.f32 %v2315_v36, %v2314_v21  ;;  %v2338_v41 = vmul.f32 %v2038_v38, %v2038_v38  ;;  %v3349_v13 = vpop.f32.mrb[73].mxu0  ;;  %v1994_v43 = vpop.f32.mrb[74].mxu1  ;;  %v2317_v44 = vsel %vm533_vm2, %v2038_v38, 0.0 }
 0x50e   : > { %v2348_v24 = vsel %vm533_vm2, %v2337_v37, 0.0  ;;  %v2041_v45 = vpop.f32.mrb[74].mxu0  ;;  %v3338_v46 = vpop.f32.mrb[75].mxu1 }
 0x50f   : > { %v2349_v42 = vadd.f32 %v2348_v24, %v2347_v29  ;;  %v2318_v9 = vadd.f32 %v2317_v44, %v2316_v39  ;;  %v3350_v10 = vpop.f32.mrb[75].mxu0  ;;  %v2350_v47 = vsel %vm533_vm2, %v2338_v41, 0.0  ;;  %v4231_v29 = vrot.slane %v2203_v31, %v2209_v63 }
 0x510   : > { %v4247_v10 = vrot.slane %v2219_v33, %v2209_v63 }
 0x511   : > { %v2351_v48 = vadd.f32 %v2350_v47, %v2349_v42 }
 0x53b   : > { %v2085_v11 = vpop.f32.mrb[76].mxu1 }
 0x53c   : > { %v2170_v50 = vcombine.low %v1991_v34, %v2085_v11  ;;  %v2171_v51 = vcombine.high %v1991_v34, %v2085_v11  ;;  %v2319_v52 = vsel %vm533_vm2, %v2085_v11, 0.0  ;;  %v2339_v53 = vmul.f32 %v2085_v11, %v2085_v11  ;;  %v3361_v54 = vpop.f32.mrb[77].mxu1 }
 0x53d   : > { %v2320_v55 = vadd.f32 %v2319_v52, %v2318_v9  ;;  %v2088_v56 = vpop.f32.mrb[78].mxu1 }
 0x53e   : > { %v2352_v57 = vsel %vm533_vm2, %v2339_v53, 0.0  ;;  %v3362_v58 = vpop.f32.mrb[79].mxu1  ;;  %v2178_v6 = vrot.slane %v2170_v50, %v4193_v8  ;;  %v2185_v17 = vrot.slane %v2171_v51, %v4193_v8 }
 0x53f   : > { %v2353_v59 = vadd.f32 %v2352_v57, %v2351_v48 }
 0x543   : > { %v2398_v60 = vpop.f32.mrb[80].mxu1 }
 0x544   : > { %v2132_v61 = vpop.f32.mrb[76].mxu0  ;;  %v3379_v62 = vpop.f32.mrb[81].mxu1  ;;  %v2684_v35 = vmul.f32 %v2398_v60, %v2398_v60 }
 0x545   : > { %v2186_v0 = vcombine.low %v2038_v38, %v2132_v61  ;;  %v2187_v1 = vcombine.high %v2038_v38, %v2132_v61  ;;  %v2321_v3 = vsel %vm533_vm2, %v2132_v61, 0.0  ;;  %v2340_v5 = vmul.f32 %v2132_v61, %v2132_v61  ;;  %v3373_v2 = vpop.f32.mrb[77].mxu0  ;;  %v2401_v4 = vpop.f32.mrb[82].mxu1 }
 0x546   : > { %v2322_v14 = vadd.f32 %v2321_v3, %v2320_v55  ;;  %v2135_v15 = vpop.f32.mrb[78].mxu0  ;;  %v3380_v16 = vpop.f32.mrb[83].mxu1  ;;  %v2693_v49 = vsel %vm2692_vm5, %v2684_v35, 0.0 }
 0x547   : > { %v2194_v18 = vrot.slane %v2186_v0, %v4193_v8  ;;  %v2201_v19 = vrot.slane %v2187_v1, %v4193_v8  ;;  %v2354_v7 = vsel %vm533_vm2, %v2340_v5, 0.0  ;;  %v3374_v21 = vpop.f32.mrb[79].mxu0  ;;  %v4236_v8 = vrot.slane %v2202_v32, %v2209_v63  ;;  %v2332_v0 = vld [vmem:[%s3829_s17 + $0x1] sm:$0x1] }
 0x548   : > { %v2323_v22 = vrot.slane %v2322_v14, 4  ;;  %v2355_v27 = vadd.f32 %v2354_v7, %v2353_v59 }
 0x549   : > { %v2250_v34 = vcombine.low %v2185_v17, %v2201_v19  ;;  %v2235_v36 = vcombine.high %v2178_v6, %v2194_v18  ;;  %v2234_v37 = vcombine.low %v2178_v6, %v2194_v18  ;;  %v2251_v38 = vcombine.high %v2185_v17, %v2201_v19 }
 0x54a   : > { %v2324_v39 = vadd.f32 %v2323_v22, %v2322_v14  ;;  %v2356_v41 = vrot.slane %v2355_v27, 4 }
 0x54b   : > { %v2478_v13 = vpop.f32.mrb[84].mxu1  ;;  %v4238_v43 = vrot.slane %v2250_v34, %v2209_v63  ;;  %v2249_v24 = vrot.slane %v2235_v36, %v2209_v63  ;;  %v4240_v30 = vrot.slane %v2234_v37, %v2209_v63  ;;  %v4242_v31 = vrot.slane %v2251_v38, %v2209_v63 }
 0x54c   : > { %v2325_v44 = vrot.slane %v2324_v39, 2  ;;  %v2357_v45 = vadd.f32 %v2356_v41, %v2355_v27  ;;  %v2686_v46 = vmul.f32 %v2478_v13, %v2478_v13  ;;  %v2438_v42 = vpop.f32.mrb[80].mxu0  ;;  %v3391_v9 = vpop.f32.mrb[85].mxu1 }
 0x54d   : > { %v2685_v20 = vmul.f32 %v2438_v42, %v2438_v42  ;;  %v3385_v25 = vpop.f32.mrb[81].mxu0  ;;  %v2481_v32 = vpop.f32.mrb[86].mxu1  ;;  %v2271_v47 = vcombine.high %v4229_v28, %v4238_v43  ;;  %v2268_v48 = vcombine.low %v4231_v29, %v2249_v24  ;;  %v2269_v11 = vcombine.high %v4231_v29, %v2249_v24 }
 0x54e   : > { %v2326_v12 = vadd.f32 %v2325_v44, %v2324_v39  ;;  %v2358_v50 = vrot.slane %v2357_v45, 2  ;;  %v2441_v51 = vpop.f32.mrb[82].mxu0  ;;  %v3392_v52 = vpop.f32.mrb[87].mxu1  ;;  %v2267_v23 = vcombine.high %v4236_v8, %v4240_v30  ;;  %v2272_v53 = vcombine.low %v4247_v10, %v4242_v31 }
 0x54f   : > { %v2694_v26 = vsel %vm2692_vm5, %v2685_v20, 0.0  ;;  %v3386_v33 = vpop.f32.mrb[83].mxu0  ;;  %2287 = vrot.lane.b32.xlu1 %v2271_v47, %s3745_s29  ;;  %v2273_v54 = vcombine.high %v4247_v10, %v4242_v31  ;;  %v2270_v55 = vcombine.low %v4229_v28, %v4238_v43  ;;  %v2266_v59 = vcombine.low %v4236_v8, %v4240_v30 }
 0x550   : > { %v2327_v56 = vrot.slane %v2326_v12, 1  ;;  %v2359_v57 = vadd.f32 %v2358_v50, %v2357_v45  ;;  %v2695_v58 = vadd.f32 %v2694_v26, %v2693_v49  ;;  %v2696_v60 = vsel %vm2692_vm5, %v2686_v46, 0.0 }
 0x552   : > { %v2328_v61 = vadd.f32 %v2327_v56, %v2326_v12  ;;  %v2360_v62 = vrot.slane %v2359_v57, 1  ;;  %v2697_v63 = vadd.f32 %v2696_v60, %v2695_v58 }
 0x553   : > { %2279 = vrot.lane.b32.xlu1 %v2268_v48, %s3746_s30  ;;  %v2558_v1 = vpop.f32.mrb[88].mxu1 }
 0x554   : > { %v2329_v3 = vadd.f32 %v2328_v61, %v2307_v40  ;;  %v2361_v5 = vadd.f32 %v2360_v62, %v2359_v57  ;;  %v2518_v2 = vpop.f32.mrb[84].mxu0  ;;  %v3403_v4 = vpop.f32.mrb[89].mxu1  ;;  %v2688_v6 = vmul.f32 %v2558_v1, %v2558_v1 }
 0x555   : > { %v2687_v14 = vmul.f32 %v2518_v2, %v2518_v2  ;;  %v3397_v15 = vpop.f32.mrb[85].mxu0  ;;  %v2561_v16 = vpop.f32.mrb[90].mxu1  ;;  %v2752_v2 = vld [vmem:[%s3824_s14] sm:$0x1] }
 0x556   : > { %2331 = vst.msk [vmem:[%s3829_s17] sm:$0x1] %vm2330_vm6, %v2329_v3  ;;  %v2362_v17 = vadd.f32 %v2361_v5, %v2332_v0  ;;  %v2521_v18 = vpop.f32.mrb[86].mxu0  ;;  %v3404_v19 = vpop.f32.mrb[91].mxu1  ;;  %v2700_v27 = vsel %vm2692_vm5, %v2688_v6, 0.0 }
 0x557   : > { %v2698_v7 = vsel %vm2692_vm5, %v2687_v14, 0.0  ;;  %v3398_v21 = vpop.f32.mrb[87].mxu0  ;;  %2283 = vrot.lane.b32.xlu1 %v2269_v11, %s3747_s6  ;;  %v2741_v11 = vpop.xlane.xlu1 %2740 }
 0x558   : > { %2363 = vst.msk [vmem:[%s3829_s17 + $0x1] sm:$0x1] %vm2330_vm6, %v2362_v17  ;;  %v2699_v22 = vadd.f32 %v2698_v7, %v2697_v63  ;;  %v2742_v49 = vrot.slane %v2741_v11, 4 }
 0x55a   : > { %v2701_v29 = vadd.f32 %v2700_v27, %v2699_v22  ;;  %v2743_v50 = vadd.f32 %v2742_v49, %v2741_v11 }
 0x55b   : > { %v2638_v34 = vpop.f32.mrb[92].mxu1 }
 0x55c   : > { %v2598_v36 = vpop.f32.mrb[88].mxu0  ;;  %v3415_v37 = vpop.f32.mrb[93].mxu1  ;;  %v2690_v38 = vmul.f32 %v2638_v34, %v2638_v34  ;;  %v2744_v51 = vrot.slane %v2743_v50, 2 }
 0x55d   : > { %v2689_v35 = vmul.f32 %v2598_v36, %v2598_v36  ;;  %v3409_v39 = vpop.f32.mrb[89].mxu0  ;;  %v2641_v41 = vpop.f32.mrb[94].mxu1 }
 0x55e   : > { %v2601_v13 = vpop.f32.mrb[90].mxu0  ;;  %v3416_v24 = vpop.f32.mrb[95].mxu1  ;;  %v2704_v46 = vsel %vm2692_vm5, %v2690_v38, 0.0  ;;  %v2745_v58 = vadd.f32 %v2744_v51, %v2743_v50 }
 0x55f   : > { %v2702_v31 = vsel %vm2692_vm5, %v2689_v35, 0.0  ;;  %v3410_v44 = vpop.f32.mrb[91].mxu0 }
 0x560   : > { %v2703_v45 = vadd.f32 %v2702_v31, %v2701_v29  ;;  %v2746_v63 = vrot.slane %v2745_v58, 1 }
 0x562   : > { %v2705_v42 = vadd.f32 %v2704_v46, %v2703_v45  ;;  %v2747_v3 = vadd.f32 %v2746_v63, %v2745_v58 }
 0x564   : > { %v2678_v9 = vpop.f32.mrb[92].mxu0 }
 0x565   : > { %v2691_v10 = vmul.f32 %v2678_v9, %v2678_v9  ;;  %v3421_v20 = vpop.f32.mrb[93].mxu0 }
 0x566   : > { %v2681_v25 = vpop.f32.mrb[94].mxu0 }
 0x567   : > { %v3422_v32 = vpop.f32.mrb[95].mxu0  ;;  %v2706_v47 = vsel %vm2692_vm5, %v2691_v10, 0.0 }
 0x568   : > { %v2707_v48 = vadd.f32 %v2706_v47, %v2705_v42 }
 0x56a   : > { %2708 = vadd.xlane.f32.xlu0 %v2707_v48 }
 0x580   : > { %2275 = vrot.lane.b32.xlu0 %v2267_v23, %s3745_s29 }
 0x584   : > { %2291 = vrot.lane.b32.xlu0 %v2272_v53, %s3746_s30 }
 0x588   : > { %2295 = vrot.lane.b32.xlu0 %v2273_v54, %s3747_s6 }
 0x5c1   : > { %v2288_v12 = vpop.permute.xlu1 %2287 }
 0x5c2   : > { %v2302_v1 = vsel %vm533_vm2, %v2270_v55, %v2288_v12 }
 0x5c5   : > { %v2280_v52 = vpop.permute.xlu1 %2279 }
 0x5c9   : > { %v2284_v53 = vpop.permute.xlu1 %2283 }
 0x5f7   : > { %v2709_v26 = vpop.xlane.xlu0 %2708 }
 0x5f8   : > { %v2710_v33 = vrot.slane %v2709_v26, 4 }
 0x5fa   : > { %v2711_v56 = vadd.f32 %v2710_v33, %v2709_v26 }
 0x5fb   : > { %v2276_v57 = vpop.permute.xlu0 %2275 }
 0x5fc   : > { %v2712_v40 = vrot.slane %v2711_v56, 2  ;;  %v2298_v23 = vsel %vm533_vm2, %v2266_v59, %v2276_v57 }
 0x5fd   : > { %v2299_v54 = vsel %vm1665_vm3, %v2298_v23, %v2280_v52 }
 0x5fe   : > { %v2301_v60 = vsel %vm2300_vm7, %v2299_v54, %v2284_v53  ;;  %v2713_v61 = vadd.f32 %v2712_v40, %v2711_v56 }
 0x5ff   : > { %v2292_v62 = vpop.permute.xlu0 %2291  ;;  %2305 = vst [vmem:[%s3814_s7] sm:$0xff] %v2301_v60 }
 0x600   : > { %v2714_v0 = vrot.slane %v2713_v61, 1  ;;  %v2303_v30 = vsel %vm1665_vm3, %v2302_v1, %v2292_v62 }
 0x602   : > { %v2715_v8 = vadd.f32 %v2714_v0, %v2713_v61 }
 0x603   : > { %v2296_v59 = vpop.permute.xlu0 %2295 }
 0x604   : > { %v2304_v5 = vsel %vm2300_vm7, %v2303_v30, %v2296_v59  ;;  %3426 = vpush %v2715_v8 }
 0x605   : > { %2306 = vst [vmem:[%s3814_s7 + $0x8] sm:$0xff] %v2304_v5  ;;  %3428 = vpush %v2747_v3 }
 0x635   : > { %s3427_s8 = spop %3426 }
 0x636   : > { %s3429_s9 = spop %3428 }
 0x637   : > { %s2749_s10 = smul.f32 2.0, %s3429_s9 }
 0x639   : > { %s2750_s11 = ssub.f32 %s3427_s8, %s2749_s10 }
 0x63b   : > { %s2751_s12 = sadd.f32 64.0, %s2750_s11 }
 0x63d   : > { %v2753_v28 = vstv %s2751_s12 }
 0x63e   : > { %v2754_v43 = vadd.f32 %v2753_v28, %v2752_v2 }
 0x640   : > { %2756 = vst.msk [vmem:[%s3824_s14] sm:$0x1] %vm2755_vm8, %v2754_v43 }
 0x641 PF: > { %s16_s22 = sadd.s32 1, %s3738_s22   ;;  %s4323_s18 = smov %s3730_s20 }
 0x642   : > { %p13_p9 = scmp.ge.s32.totalorder %s16_s22, 6   ;;  %s4324_s19 = smov %s3734_s21 }
 0x643   : > { %s4325_s20 = smov %s4328_s23  ;;  %s4326_s21 = smov %s4332_s24 }
 0x644   :  { %15 = sbr.rel (!%p13_p9) target bundleno = 3 (0x3), region = 90 }

</bundles_post_ra>
